<compile_context>
chip_gen: v6e
topology: v6e:2x2x1
jax: 0.10.0
libtpu: 0.0.40
codegen_flags: <defaults>
</compile_context>

<pallas_src>
import jax
import jax.numpy as jnp
import numpy as np
from jax import lax
from jax.experimental import pallas as pl
from jax.experimental.pallas import tpu as pltpu


# ----------------------------------------------------------------------------
# Pallas kernel: whole forward pass in one invocation.
# ----------------------------------------------------------------------------
def _vanilla_rnn_kernel(tok_ref, emb_ref, h0_ref, wih_ref, whh_ref, bias_ref,
                        wfc_ref, bfc_ref, logits_ref, hfinal_ref):
    """tok_ref: (T*B, 1) int32 time-major token ids.  logits_ref: (B, T, V)."""
    TB = tok_ref.shape[0]
    V, E = emb_ref.shape
    B, H = h0_ref.shape
    T = TB // B

    # ---- Phase 1: fused embedding gather + batched input projection ---------
    # One-hot gather on the MXU (exact row selection, no cross-lane gather):
    #   x_all[r] = embedding[tok[r]]            -> (T*B, E)
    #   pre[r]   = x_all[r] @ W_ih^T + (b_ih + b_hh)
    tok = tok_ref[...]                                                 # (TB, 1)
    onehot = (tok == lax.broadcasted_iota(jnp.int32, (TB, V), 1)
              ).astype(jnp.float32)                                    # (TB, V)
    x_all = jnp.dot(onehot, emb_ref[...],
                    preferred_element_type=jnp.float32)                # (TB, E)
    pre_all = (jnp.dot(x_all, wih_ref[...],
                       preferred_element_type=jnp.float32)
               + bias_ref[...])                                        # (TB, H)

    # ---- Phase 2: serial recurrence (only H x H matmul + tanh on the chain) -
    whh = whh_ref[...]                                                 # hoisted
    h = h0_ref[...]                                                    # (B, H)
    h_list = []
    for t in range(T):                                                 # T static, small
        lo = t * B
        h = jnp.tanh(jnp.dot(h, whh, preferred_element_type=jnp.float32)
                     + pre_all[lo:lo + B])
        h_list.append(h)                                               # stays in vregs
    hfinal_ref[...] = h

    # ---- Phase 3: batched fc projection, batch-first staging ----------------
    # Transpose the small hidden slab (in vregs) BEFORE the matmul so logits
    # come out already batch-first -> one unmasked lane-dense bulk store.
    h_bt = jnp.stack(h_list, axis=1).reshape(B * T, H)                 # (B*T, H)
    logits = (jnp.dot(h_bt, wfc_ref[...],
                      preferred_element_type=jnp.float32)
              + bfc_ref[...])                                          # (B*T, V)
    logits_ref[...] = logits.reshape(B, T, V)


def _rnn_pallas(tok_tm, emb, h0, wih_t, whh_t, bias, wfc_t, bfc):
    TB = tok_tm.shape[0]
    V, E = emb.shape
    B, H = h0.shape
    T = TB // B

    flops = 2 * TB * (V * E + E * H + H * H + H * V)
    bytes_accessed = sum(int(np.prod(a.shape)) * a.dtype.itemsize
                         for a in (tok_tm, emb, h0, wih_t, whh_t, bias, wfc_t, bfc))
    bytes_accessed += (B * T * V + B * H) * 4                          # outputs

    vmem = lambda: pl.BlockSpec(memory_space=pltpu.MemorySpace.VMEM)
    return pl.pallas_call(
        _vanilla_rnn_kernel,
        out_shape=(jax.ShapeDtypeStruct((B, T, V), jnp.float32),       # logits, batch_first
                   jax.ShapeDtypeStruct((B, H), jnp.float32)),         # final hidden
        in_specs=[vmem() for _ in range(8)],
        out_specs=(vmem(), vmem()),
        cost_estimate=pl.CostEstimate(flops=flops,
                                      transcendentals=TB * H,
                                      bytes_accessed=bytes_accessed),
    )(tok_tm, emb, h0, wih_t, whh_t, bias, wfc_t, bfc)


# ----------------------------------------------------------------------------
# Parameters (PyTorch layouts) + one-time repack for the kernel.
# ----------------------------------------------------------------------------
def init_params(key, vocab_size, embedding_dim, hidden_dim):
    ks = jax.random.split(key, 7)
    s_rnn = 1.0 / np.sqrt(hidden_dim)
    s_fc = 1.0 / np.sqrt(hidden_dim)
    return {
        "embedding": jax.random.normal(ks[0], (vocab_size, embedding_dim),
                                       jnp.float32),
        # nn.RNN parameter shapes
        "weight_ih": jax.random.uniform(ks[1], (hidden_dim, embedding_dim),
                                        jnp.float32, -s_rnn, s_rnn),
        "weight_hh": jax.random.uniform(ks[2], (hidden_dim, hidden_dim),
                                        jnp.float32, -s_rnn, s_rnn),
        "bias_ih": jax.random.uniform(ks[3], (hidden_dim,), jnp.float32,
                                      -s_rnn, s_rnn),
        "bias_hh": jax.random.uniform(ks[4], (hidden_dim,), jnp.float32,
                                      -s_rnn, s_rnn),
        # nn.Linear parameter shapes
        "fc_weight": jax.random.uniform(ks[5], (vocab_size, hidden_dim),
                                        jnp.float32, -s_fc, s_fc),
        "fc_bias": jax.random.uniform(ks[6], (vocab_size,), jnp.float32,
                                      -s_fc, s_fc),
    }


def prepare_kernel_params(params):
    """One-time repack (outside jit): transposed weights + folded RNN biases."""
    return {
        "embedding": params["embedding"],                               # (V, E)
        "wih_t": params["weight_ih"].T,                                 # (E, H)
        "whh_t": params["weight_hh"].T,                                 # (H, H)
        "bias": (params["bias_ih"] + params["bias_hh"])[None, :],       # (1, H)
        "wfc_t": params["fc_weight"].T,                                 # (H, V)
        "bfc": params["fc_bias"][None, :],                              # (1, V)
    }


# ----------------------------------------------------------------------------
# Module-level wrapper (mirrors VanillaRNN.forward)
# ----------------------------------------------------------------------------
@jax.jit
def vanilla_rnn_forward(tokens, kparams, hidden=None):
    """tokens: int32 (B, T).  Returns (logits (B, T, V), hidden (1, B, H))."""
    B, T = tokens.shape
    H = kparams["whh_t"].shape[0]
    if hidden is None:
        hidden = jnp.zeros((1, B, H), jnp.float32)

    # Only the tiny int token matrix is reshuffled outside the kernel
    # (time-major flatten, 4*T*B bytes); the embedding gather happens in-kernel.
    tok_tm = tokens.T.reshape(T * B, 1).astype(jnp.int32)               # (T*B, 1)

    logits, h_final = _rnn_pallas(
        tok_tm,
        kparams["embedding"],      # (V, E)
        hidden[0],                 # (B, H)
        kparams["wih_t"],          # (E, H)
        kparams["whh_t"],          # (H, H)
        kparams["bias"],           # (1, H)
        kparams["wfc_t"],          # (H, V)
        kparams["bfc"],            # (1, V)
    )
    return logits, h_final[None]   # (B, T, V), (1, B, H)


def _reference_forward(tokens, params, hidden=None):
    """Pure-JAX reference matching nn.Embedding -> nn.RNN -> nn.Linear."""
    B, T = tokens.shape
    H = params["weight_hh"].shape[0]
    h = jnp.zeros((B, H), jnp.float32) if hidden is None else hidden[0]
    emb = jnp.take(params["embedding"], tokens, axis=0)                 # (B, T, E)
    outs = []
    for t in range(T):
        h = jnp.tanh(emb[:, t] @ params["weight_ih"].T
                     + h @ params["weight_hh"].T
                     + params["bias_ih"] + params["bias_hh"])
        outs.append(h @ params["fc_weight"].T + params["fc_bias"])
    return jnp.stack(outs, axis=1), h[None]


if __name__ == "__main__":
    # Small shapes consistent with the module's forward.
    vocab_size, embedding_dim, hidden_dim = 256, 128, 128
    batch, seq = 8, 8

    key = jax.random.PRNGKey(0)
    pkey, tkey = jax.random.split(key)
    params = init_params(pkey, vocab_size, embedding_dim, hidden_dim)
    kparams = prepare_kernel_params(params)
    tokens = jax.random.randint(tkey, (batch, seq), 0, vocab_size, jnp.int32)

    out, hid = vanilla_rnn_forward(tokens, kparams)
    out, hid = jax.block_until_ready((out, hid))

    assert out.shape == (batch, seq, vocab_size)
    assert hid.shape == (1, batch, hidden_dim)

    ref_out, ref_hid = _reference_forward(tokens, params)
    np.testing.assert_allclose(np.asarray(out), np.asarray(ref_out),
                               rtol=1e-4, atol=1e-4)
    np.testing.assert_allclose(np.asarray(hid), np.asarray(ref_hid),
                               rtol=1e-4, atol=1e-4)

    print("KERNEL_OK")
</pallas_src>

<mosaic_0001>
module attributes {stable_mosaic.version = 11 : i64} {
  func.func @_vanilla_rnn_kernel(%arg0: memref<64x1xi32, #tpu.memory_space<vmem>>, %arg1: memref<256x128xf32, #tpu.memory_space<vmem>>, %arg2: memref<8x128xf32, #tpu.memory_space<vmem>>, %arg3: memref<128x128xf32, #tpu.memory_space<vmem>>, %arg4: memref<128x128xf32, #tpu.memory_space<vmem>>, %arg5: memref<1x128xf32, #tpu.memory_space<vmem>>, %arg6: memref<128x256xf32, #tpu.memory_space<vmem>>, %arg7: memref<1x256xf32, #tpu.memory_space<vmem>>, %arg8: memref<8x8x256xf32, #tpu.memory_space<vmem>>, %arg9: memref<8x128xf32, #tpu.memory_space<vmem>>) attributes {dimension_semantics = [], scalar_prefetch = 0 : i64, scratch_operands = 0 : i64, tpu.core_type = #tpu.core_type<tc>} {
    %c0 = arith.constant 0 : index
    %c0_0 = arith.constant 0 : index
    %0 = vector.load %arg0[%c0, %c0_0] : memref<64x1xi32, #tpu.memory_space<vmem>>, vector<64x1xi32>
    %1 = tpu.iota {dimensions = array<i32: 1>} : vector<64x256xi32>
    %2 = vector.broadcast %0 : vector<64x1xi32> to vector<64x256xi32>
    %3 = arith.cmpi eq, %2, %1 : vector<64x256xi32>
    %4 = arith.extui %3 : vector<64x256xi1> to vector<64x256xi32>
    %5 = arith.sitofp %4 : vector<64x256xi32> to vector<64x256xf32>
    %c0_1 = arith.constant 0 : index
    %c0_2 = arith.constant 0 : index
    %6 = vector.load %arg1[%c0_1, %c0_2] : memref<256x128xf32, #tpu.memory_space<vmem>>, vector<256x128xf32>
    %cst = arith.constant dense<0.000000e+00> : vector<64x128xf32>
    %7 = tpu.matmul %5, %6, %cst {dimension_numbers = #tpu.dot_dimension_numbers<[1], [0], [0], [1], [0, 0, 1, 1], [], []>} : vector<64x256xf32>, vector<256x128xf32>, vector<64x128xf32> -> vector<64x128xf32>
    %c0_3 = arith.constant 0 : index
    %c0_4 = arith.constant 0 : index
    %8 = vector.load %arg3[%c0_3, %c0_4] : memref<128x128xf32, #tpu.memory_space<vmem>>, vector<128x128xf32>
    %cst_5 = arith.constant dense<0.000000e+00> : vector<64x128xf32>
    %9 = tpu.matmul %7, %8, %cst_5 {dimension_numbers = #tpu.dot_dimension_numbers<[1], [0], [0], [1], [0, 0, 1, 1], [], []>} : vector<64x128xf32>, vector<128x128xf32>, vector<64x128xf32> -> vector<64x128xf32>
    %c0_6 = arith.constant 0 : index
    %c0_7 = arith.constant 0 : index
    %10 = vector.load %arg5[%c0_6, %c0_7] : memref<1x128xf32, #tpu.memory_space<vmem>>, vector<1x128xf32>
    %11 = vector.broadcast %10 : vector<1x128xf32> to vector<64x128xf32>
    %12 = arith.addf %9, %11 : vector<64x128xf32>
    %c0_8 = arith.constant 0 : index
    %c0_9 = arith.constant 0 : index
    %13 = vector.load %arg4[%c0_8, %c0_9] : memref<128x128xf32, #tpu.memory_space<vmem>>, vector<128x128xf32>
    %c0_10 = arith.constant 0 : index
    %c0_11 = arith.constant 0 : index
    %14 = vector.load %arg2[%c0_10, %c0_11] : memref<8x128xf32, #tpu.memory_space<vmem>>, vector<8x128xf32>
    %cst_12 = arith.constant dense<0.000000e+00> : vector<8x128xf32>
    %15 = tpu.matmul %14, %13, %cst_12 {dimension_numbers = #tpu.dot_dimension_numbers<[1], [0], [0], [1], [0, 0, 1, 1], [], []>} : vector<8x128xf32>, vector<128x128xf32>, vector<8x128xf32> -> vector<8x128xf32>
    %16 = vector.extract_strided_slice %12 {offsets = [0, 0], sizes = [8, 128], strides = [1, 1]} : vector<64x128xf32> to vector<8x128xf32>
    %17 = arith.addf %15, %16 : vector<8x128xf32>
    %18 = math.tanh %17 : vector<8x128xf32>
    %cst_13 = arith.constant dense<0.000000e+00> : vector<8x128xf32>
    %19 = tpu.matmul %18, %13, %cst_13 {dimension_numbers = #tpu.dot_dimension_numbers<[1], [0], [0], [1], [0, 0, 1, 1], [], []>} : vector<8x128xf32>, vector<128x128xf32>, vector<8x128xf32> -> vector<8x128xf32>
    %20 = vector.extract_strided_slice %12 {offsets = [8, 0], sizes = [8, 128], strides = [1, 1]} : vector<64x128xf32> to vector<8x128xf32>
    %21 = arith.addf %19, %20 : vector<8x128xf32>
    %22 = math.tanh %21 : vector<8x128xf32>
    %cst_14 = arith.constant dense<0.000000e+00> : vector<8x128xf32>
    %23 = tpu.matmul %22, %13, %cst_14 {dimension_numbers = #tpu.dot_dimension_numbers<[1], [0], [0], [1], [0, 0, 1, 1], [], []>} : vector<8x128xf32>, vector<128x128xf32>, vector<8x128xf32> -> vector<8x128xf32>
    %24 = vector.extract_strided_slice %12 {offsets = [16, 0], sizes = [8, 128], strides = [1, 1]} : vector<64x128xf32> to vector<8x128xf32>
    %25 = arith.addf %23, %24 : vector<8x128xf32>
    %26 = math.tanh %25 : vector<8x128xf32>
    %cst_15 = arith.constant dense<0.000000e+00> : vector<8x128xf32>
    %27 = tpu.matmul %26, %13, %cst_15 {dimension_numbers = #tpu.dot_dimension_numbers<[1], [0], [0], [1], [0, 0, 1, 1], [], []>} : vector<8x128xf32>, vector<128x128xf32>, vector<8x128xf32> -> vector<8x128xf32>
    %28 = vector.extract_strided_slice %12 {offsets = [24, 0], sizes = [8, 128], strides = [1, 1]} : vector<64x128xf32> to vector<8x128xf32>
    %29 = arith.addf %27, %28 : vector<8x128xf32>
    %30 = math.tanh %29 : vector<8x128xf32>
    %cst_16 = arith.constant dense<0.000000e+00> : vector<8x128xf32>
    %31 = tpu.matmul %30, %13, %cst_16 {dimension_numbers = #tpu.dot_dimension_numbers<[1], [0], [0], [1], [0, 0, 1, 1], [], []>} : vector<8x128xf32>, vector<128x128xf32>, vector<8x128xf32> -> vector<8x128xf32>
    %32 = vector.extract_strided_slice %12 {offsets = [32, 0], sizes = [8, 128], strides = [1, 1]} : vector<64x128xf32> to vector<8x128xf32>
    %33 = arith.addf %31, %32 : vector<8x128xf32>
    %34 = math.tanh %33 : vector<8x128xf32>
    %cst_17 = arith.constant dense<0.000000e+00> : vector<8x128xf32>
    %35 = tpu.matmul %34, %13, %cst_17 {dimension_numbers = #tpu.dot_dimension_numbers<[1], [0], [0], [1], [0, 0, 1, 1], [], []>} : vector<8x128xf32>, vector<128x128xf32>, vector<8x128xf32> -> vector<8x128xf32>
    %36 = vector.extract_strided_slice %12 {offsets = [40, 0], sizes = [8, 128], strides = [1, 1]} : vector<64x128xf32> to vector<8x128xf32>
    %37 = arith.addf %35, %36 : vector<8x128xf32>
    %38 = math.tanh %37 : vector<8x128xf32>
    %cst_18 = arith.constant dense<0.000000e+00> : vector<8x128xf32>
    %39 = tpu.matmul %38, %13, %cst_18 {dimension_numbers = #tpu.dot_dimension_numbers<[1], [0], [0], [1], [0, 0, 1, 1], [], []>} : vector<8x128xf32>, vector<128x128xf32>, vector<8x128xf32> -> vector<8x128xf32>
    %40 = vector.extract_strided_slice %12 {offsets = [48, 0], sizes = [8, 128], strides = [1, 1]} : vector<64x128xf32> to vector<8x128xf32>
    %41 = arith.addf %39, %40 : vector<8x128xf32>
    %42 = math.tanh %41 : vector<8x128xf32>
    %cst_19 = arith.constant dense<0.000000e+00> : vector<8x128xf32>
    %43 = tpu.matmul %42, %13, %cst_19 {dimension_numbers = #tpu.dot_dimension_numbers<[1], [0], [0], [1], [0, 0, 1, 1], [], []>} : vector<8x128xf32>, vector<128x128xf32>, vector<8x128xf32> -> vector<8x128xf32>
    %44 = vector.extract_strided_slice %12 {offsets = [56, 0], sizes = [8, 128], strides = [1, 1]} : vector<64x128xf32> to vector<8x128xf32>
    %45 = arith.addf %43, %44 : vector<8x128xf32>
    %46 = math.tanh %45 : vector<8x128xf32>
    %c0_20 = arith.constant 0 : index
    %c0_21 = arith.constant 0 : index
    %47 = vector.load %arg9[%c0_20, %c0_21] : memref<8x128xf32, #tpu.memory_space<vmem>>, vector<8x128xf32>
    tpu.vector_store %arg9[%c0_20, %c0_21], %46 {strides = array<i32>} : memref<8x128xf32, #tpu.memory_space<vmem>>, vector<8x128xf32>,
    %48 = vector.shape_cast %18 : vector<8x128xf32> to vector<8x1x128xf32>
    %49 = vector.shape_cast %22 : vector<8x128xf32> to vector<8x1x128xf32>
    %50 = vector.shape_cast %26 : vector<8x128xf32> to vector<8x1x128xf32>
    %51 = vector.shape_cast %30 : vector<8x128xf32> to vector<8x1x128xf32>
    %52 = vector.shape_cast %34 : vector<8x128xf32> to vector<8x1x128xf32>
    %53 = vector.shape_cast %38 : vector<8x128xf32> to vector<8x1x128xf32>
    %54 = vector.shape_cast %42 : vector<8x128xf32> to vector<8x1x128xf32>
    %55 = vector.shape_cast %46 : vector<8x128xf32> to vector<8x1x128xf32>
    %56 = tpu.concatenate %48, %49, %50, %51, %52, %53, %54, %55 in 1 : vector<8x1x128xf32>, vector<8x1x128xf32>, vector<8x1x128xf32>, vector<8x1x128xf32>, vector<8x1x128xf32>, vector<8x1x128xf32>, vector<8x1x128xf32>, vector<8x1x128xf32> -> vector<8x8x128xf32>
    %57 = vector.shape_cast %56 : vector<8x8x128xf32> to vector<64x128xf32>
    %c0_22 = arith.constant 0 : index
    %c0_23 = arith.constant 0 : index
    %58 = vector.load %arg6[%c0_22, %c0_23] : memref<128x256xf32, #tpu.memory_space<vmem>>, vector<128x256xf32>
    %cst_24 = arith.constant dense<0.000000e+00> : vector<64x256xf32>
    %59 = tpu.matmul %57, %58, %cst_24 {dimension_numbers = #tpu.dot_dimension_numbers<[1], [0], [0], [1], [0, 0, 1, 1], [], []>} : vector<64x128xf32>, vector<128x256xf32>, vector<64x256xf32> -> vector<64x256xf32>
    %c0_25 = arith.constant 0 : index
    %c0_26 = arith.constant 0 : index
    %60 = vector.load %arg7[%c0_25, %c0_26] : memref<1x256xf32, #tpu.memory_space<vmem>>, vector<1x256xf32>
    %61 = vector.broadcast %60 : vector<1x256xf32> to vector<64x256xf32>
    %62 = arith.addf %59, %61 : vector<64x256xf32>
    %63 = vector.shape_cast %62 : vector<64x256xf32> to vector<8x8x256xf32>
    %c0_27 = arith.constant 0 : index
    %c0_28 = arith.constant 0 : index
    %c0_29 = arith.constant 0 : index
    %64 = vector.load %arg8[%c0_27, %c0_28, %c0_29] : memref<8x8x256xf32, #tpu.memory_space<vmem>>, vector<8x8x256xf32>
    tpu.vector_store %arg8[%c0_27, %c0_28, %c0_29], %63 {strides = array<i32>} : memref<8x8x256xf32, #tpu.memory_space<vmem>>, vector<8x8x256xf32>,
    return
  }
}

</mosaic_0001>

<bundles_post_ra>
// kernel: squeeze.1
= control target key start
LH: loop header
LB: loop body
LE: loop exit
PB: predicated region body
PF: predicated region fallthrough
CT: control target
= control target key end

     0   :  { %s20_s0 = inlined_call_operand.<no memory space> [shape: f32[], index: 0, kind: input, shape index: {}]   ;;  %s21_s1 = inlined_call_operand.vmem [shape: f32[8,128], index: 1, kind: output, shape index: {}]  }
   0x1   :  { %v2_v0 = vstv %s20_s0 }
   0x2   :  { %3 = vst [vmem:[%s21_s1] sm:$0xff] %v2_v0 }

// kernel: vanilla_rnn_forward.1
= control target key start
LH: loop header
LB: loop body
LE: loop exit
PB: predicated region body
PF: predicated region fallthrough
CT: control target
= control target key end

     0   :  { %15 = vsyncpa [#allocation3], 0  ;;  %s3497_s0 = inlined_call_operand.vmem [shape: s32[64,1], index: 0, kind: input, shape index: {}]   ;;  %s3498_s1 = inlined_call_operand.hbm [shape: f32[256,128], index: 1, kind: input, shape index: {}]   ;;  %s3499_s2 = inlined_call_operand.vmem [shape: f32[8,128], index: 2, kind: input, shape index: {}]   ;;  %s3500_s3 = inlined_call_operand.hbm [shape: f32[128,128], index: 3, kind: input, shape index: {}]   ;;  %s3501_s4 = inlined_call_operand.hbm [shape: f32[128,128], index: 4, kind: input, shape index: {}]   ;;  %s3502_s5 = inlined_call_operand.vmem [shape: f32[1,128], index: 5, kind: input, shape index: {}]   ;;  %s3503_s6 = inlined_call_operand.hbm [shape: f32[128,256], index: 6, kind: input, shape index: {}]   ;;  %s3504_s7 = inlined_call_operand.vmem [shape: f32[1,256], index: 7, kind: input, shape index: {}]   ;;  %s3505_s8 = inlined_call_operand.hbm [shape: f32[8,8,256], index: 8, kind: output, shape index: {0}]   ;;  %s3506_s9 = inlined_call_operand.hbm [shape: f32[8,128], index: 9, kind: output, shape index: {1}]  }
   0x1   :  { %16 = vsyncpa [#allocation6], 0 }
   0x2   :  { %17 = vsyncpa [#allocation9], 0 }
   0x3   :  { %18 = vsyncpa [#allocation4], 0 }
   0x4   :  { %19 = vsyncpa [#allocation12], 0  ;;  %s2725_s30 = smov [#allocation5]   ;;  %s2726_s11 = smov [#allocation2]  }
   0x5   :  { %s41_s10 = sshll.u32 %s2725_s30, 4  ;;  %s27_s12 = sshll.u32 %s2726_s11, 4  ;;  %s42_s10 = int_to_ptr.vmem [resolvable:$true] %s41_s10  ;;  %s28_s12 = int_to_ptr.vmem [resolvable:$true] %s27_s12 }
   0x6   :  { %s2603_s13 = scalar_lea.vmem %s42_s10, 2048  ;;  %p2608_p1 = scmp.lt.s32.totalorder %s42_s10, %s42_s10 }
   0x7   :  { %p2604_p0 = scmp.ne.s32.totalorder %s42_s10, %s2603_s13  ;;  %p2609_p2 = scmp.lt.s32.totalorder %s2603_s13, %s2603_s13 }
   0x9   :  { %p2610_p3 = por %p2609_p2, %p2608_p1 }
   0xb   :  { %p2611_p4 = pnand %p2610_p3, %p2604_p0 }
   0xd   :  { %2614 = shalt.err (!%p2611_p4)
}
   0xe   :  { %s2727_s14 = smov 128   ;;  %s2728_s15 = smov 8  }
   0xf   :  { %47 = dma.hbm_to_vmem [thread:$0]  %s3500_s3, 2048, %s42_s10, [#allocation6], %s2727_s14, %s2727_s14, %s2728_s15  }
  0x10   :  { %s2623_s18 = scalar_lea.vmem %s28_s12, 4096  ;;  %p2628_p6 = scmp.lt.s32.totalorder %s28_s12, %s28_s12 }
  0x11   :  { %p2624_p5 = scmp.ne.s32.totalorder %s28_s12, %s2623_s18  ;;  %p2629_p7 = scmp.lt.s32.totalorder %s2623_s18, %s2623_s18 }
  0x13   :  { %p2630_p8 = por %p2629_p7, %p2628_p6 }
  0x15   :  { %p2631_p9 = pnand %p2630_p8, %p2624_p5 }
  0x17   :  { %2634 = shalt.err (!%p2631_p9)
}
  0x18   :  { %33 = dma.hbm_to_vmem [thread:$0]  %s3498_s1, 4096, %s28_s12, [#allocation3], %s2727_s14, %s2727_s14, %s2728_s15  }
  0x19   :  { %s2729_s21 = smov [#allocation7]   ;;  %s2730_s23 = smov [#allocation8]  }
  0x1a   :  { %s53_s22 = sshll.u32 %s2729_s21, 4  ;;  %s67_s24 = sshll.u32 %s2730_s23, 4  ;;  %s54_s22 = int_to_ptr.vmem [resolvable:$true] %s53_s22  ;;  %s68_s24 = int_to_ptr.vmem [resolvable:$true] %s67_s24 }
  0x1b   :  { %s2643_s25 = scalar_lea.vmem %s54_s22, 2048  ;;  %p2648_p11 = scmp.lt.s32.totalorder %s54_s22, %s54_s22 }
  0x1c   :  { %p2644_p10 = scmp.ne.s32.totalorder %s54_s22, %s2643_s25  ;;  %p2649_p12 = scmp.lt.s32.totalorder %s2643_s25, %s2643_s25 }
  0x1e   :  { %p2650_p13 = por %p2649_p12, %p2648_p11 }
  0x20   :  { %p2651_p0 = pnand %p2650_p13, %p2644_p10 }
  0x22   :  { %2654 = shalt.err (!%p2651_p0)
}
  0x23   :  { %59 = dma.hbm_to_vmem [thread:$0]  %s3501_s4, 2048, %s54_s22, [#allocation6], %s2727_s14, %s2727_s14, %s2728_s15  }
  0x24   :  { %s2663_s27 = scalar_lea.vmem %s68_s24, 4096  ;;  %p2668_p2 = scmp.lt.s32.totalorder %s68_s24, %s68_s24 }
  0x25   :  { %p2664_p1 = scmp.ne.s32.totalorder %s68_s24, %s2663_s27  ;;  %p2669_p3 = scmp.lt.s32.totalorder %s2663_s27, %s2663_s27 }
  0x27   :  { %p2670_p4 = por %p2669_p3, %p2668_p2 }
  0x29   :  { %p2671_p5 = pnand %p2670_p4, %p2664_p1 }
  0x2b   :  { %2674 = shalt.err (!%p2671_p5)
}
  0x2c   :  { %s2731_s1 = smov 256   ;;  %s2732_s28 = smov 16  }
  0x2d   :  { %73 = dma.hbm_to_vmem [thread:$0]  %s3503_s6, 4096, %s68_s24, [#allocation9], %s2731_s1, %s2731_s1, %s2732_s28  }
  0x2e   :  { %2715 = dma.done.wait [#allocation3], 4096  }
  0x2f   :  { %2716 = vsyncadd [#allocation3], 4294963200 }
  0x30   :  { %2717 = dma.done.wait [#allocation6], 4096  }
  0x31   :  { %2718 = vsyncadd [#allocation6], 4294963200 }
  0x32   :  { %2719 = dma.done.wait [#allocation9], 4096  }
  0x33   :  { %2720 = vsyncadd [#allocation9], 4294963200  ;;  %v2733_v0 = vmov 0   ;;  %v88_v1 = vld [vmem:[%s3497_s0] sm:$0xff]  ;;  %v90_v2 = vld [vmem:[%s3497_s0 + $0x10] sm:$0xff]  ;;  %v2734_v33 = vmov 0.0   ;;  %v96_v53 = vlaneseq }
  0x34   :  { %2567 = vset.pattern.permute.xlu0 %v2733_v0  ;;  %2568 = vset.pattern.permute.xlu1 %v2733_v0  ;;  %v89_v3 = vld [vmem:[%s3497_s0 + $0x8] sm:$0xff]  ;;  %v91_v4 = vld [vmem:[%s3497_s0 + $0x18] sm:$0xff]  ;;  %v201_v7 = vld [vmem:[#allocation2 + $0xf0] sm:$0xff]  ;;  %v2735_v58 = vmov 1.0  }
  0x35   :  { %100 = vperm.xlu0 %2567, %v88_v1   ;;  %106 = vperm.xlu1 %2568, %v90_v2   ;;  %v202_v5 = vld [vmem:[#allocation2 + $0xf8] sm:$0xff]  ;;  %v185_v8 = vld [vmem:[#allocation2 + $0x70] sm:$0xff]  ;;  %v200_v9 = vld [vmem:[#allocation2 + $0xe8] sm:$0xff]  ;;  %v2871_v54 = vand.u32 127, %v96_v53 }
  0x36   :  { %v186_v6 = vld [vmem:[#allocation2 + $0x78] sm:$0xff]  ;;  %2012 = vmatprep.subr.mxu1 %v202_v5  ;;  %v92_v10 = vld [vmem:[%s3497_s0 + $0x20] sm:$0xff]  ;;  %v93_v11 = vld [vmem:[%s3497_s0 + $0x28] sm:$0xff]  ;;  %2272 = vmatprep.subr.mxu0 %v2734_v33 }
  0x37   :  { %2013 = vmatpush3.msra.mxu1 %v186_v6  ;;  %v184_v12 = vld [vmem:[#allocation2 + $0x68] sm:$0xff]  ;;  %v199_v13 = vld [vmem:[#allocation2 + $0xe0] sm:$0xff]  ;;  %v94_v15 = vld [vmem:[%s3497_s0 + $0x30] sm:$0xff]  ;;  %v2874_v55 = vadd.s32 128, %v2871_v54 }
  0x38   :  { %2014 = vmatprep.subr.mxu1 %v201_v7  ;;  %v183_v14 = vld [vmem:[#allocation2 + $0x60] sm:$0xff]  ;;  %v198_v16 = vld [vmem:[#allocation2 + $0xd8] sm:$0xff]  ;;  %v197_v18 = vld [vmem:[#allocation2 + $0xd0] sm:$0xff] }
  0x39   :  { %103 = vperm.xlu0 %2567, %v89_v3   ;;  %109 = vperm.xlu1 %2568, %v91_v4   ;;  %v182_v17 = vld [vmem:[#allocation2 + $0x58] sm:$0xff]  ;;  %v181_v19 = vld [vmem:[#allocation2 + $0x50] sm:$0xff]  ;;  %v196_v20 = vld [vmem:[#allocation2 + $0xc8] sm:$0xff] }
  0x3a   :  { %2015 = vmatpush3.msra.mxu1 %v185_v8  ;;  %v180_v21 = vld [vmem:[#allocation2 + $0x48] sm:$0xff]  ;;  %v195_v22 = vld [vmem:[#allocation2 + $0xc0] sm:$0xff]  ;;  %v194_v24 = vld [vmem:[#allocation2 + $0xb8] sm:$0xff] }
  0x3b   :  { %2016 = vmatprep.subr.mxu1 %v200_v9  ;;  %v179_v23 = vld [vmem:[#allocation2 + $0x40] sm:$0xff]  ;;  %v178_v25 = vld [vmem:[#allocation2 + $0x38] sm:$0xff]  ;;  %v193_v26 = vld [vmem:[#allocation2 + $0xb0] sm:$0xff] }
  0x3c   :  { %2017 = vmatpush3.msra.mxu1 %v184_v12  ;;  %v177_v27 = vld [vmem:[#allocation2 + $0x30] sm:$0xff]  ;;  %v192_v28 = vld [vmem:[#allocation2 + $0xa8] sm:$0xff]  ;;  %v95_v30 = vld [vmem:[%s3497_s0 + $0x38] sm:$0xff] }
  0x3d   :  { %112 = vperm.xlu0 %2567, %v92_v10   ;;  %115 = vperm.xlu1 %2568, %v93_v11   ;;  %v176_v29 = vld [vmem:[#allocation2 + $0x28] sm:$0xff]  ;;  %v191_v31 = vld [vmem:[#allocation2 + $0xa0] sm:$0xff]  ;;  %v190_v34 = vld [vmem:[#allocation2 + $0x98] sm:$0xff] }
  0x3e   :  { %2018 = vmatprep.subr.mxu1 %v199_v13  ;;  %v175_v32 = vld [vmem:[#allocation2 + $0x20] sm:$0xff]  ;;  %v174_v35 = vld [vmem:[#allocation2 + $0x18] sm:$0xff]  ;;  %v189_v37 = vld [vmem:[#allocation2 + $0x90] sm:$0xff] }
  0x3f   :  { %2019 = vmatpush3.msra.mxu1 %v183_v14  ;;  %v2830_v36 = vld [vmem:[#allocation7 + $0x78] sm:$0xff]  ;;  %v2833_v38 = vld [vmem:[#allocation7 + $0x70] sm:$0xff]  ;;  %v2836_v40 = vld [vmem:[#allocation7 + $0x68] sm:$0xff] }
  0x40   :  { %2020 = vmatprep.subr.mxu1 %v198_v16  ;;  %2273 = vmatpush3.msra.mxu0 %v2830_v36  ;;  %v173_v39 = vld [vmem:[#allocation2 + $0x10] sm:$0xff]  ;;  %v188_v41 = vld [vmem:[#allocation2 + $0x88] sm:$0xff]  ;;  %v2840_v43 = vld [vmem:[#allocation7 + $0x60] sm:$0xff] }
  0x41   :  { %118 = vperm.xlu0 %2567, %v94_v15   ;;  %2021 = vmatpush3.msra.mxu1 %v182_v17  ;;  %v172_v42 = vld [vmem:[#allocation2 + $0x8] sm:$0xff]  ;;  %v187_v44 = vld [vmem:[#allocation2 + $0x80] sm:$0xff]  ;;  %v2844_v46 = vld [vmem:[#allocation7 + $0x58] sm:$0xff] }
  0x42   :  { %2022 = vmatprep.subr.mxu1 %v197_v18  ;;  %121 = vperm.xlu1 %2568, %v95_v30   ;;  %v171_v45 = vld [vmem:[#allocation2] sm:$0xff]  ;;  %v323_v47 = vld [vmem:[#allocation5 + $0x78] sm:$0xff]  ;;  %v2848_v48 = vld [vmem:[#allocation7 + $0x50] sm:$0xff] }
  0x43   :  { %2023 = vmatpush3.msra.mxu1 %v181_v19  ;;  %2274 = vmatprep.subr.mxu0 %v2734_v33  ;;  %v2852_v49 = vld [vmem:[#allocation7 + $0x48] sm:$0xff]  ;;  %v2856_v50 = vld [vmem:[#allocation7 + $0x40] sm:$0xff]  ;;  %v2860_v51 = vld [vmem:[#allocation7 + $0x38] sm:$0xff] }
  0x44   :  { %2024 = vmatprep.subr.mxu1 %v196_v20  ;;  %2275 = vmatpush3.msra.mxu0 %v2833_v38  ;;  %v2864_v52 = vld [vmem:[#allocation7 + $0x30] sm:$0xff]  ;;  %v321_v61 = vld [vmem:[#allocation5 + $0x68] sm:$0xff]  ;;  %v320_v63 = vld [vmem:[#allocation5 + $0x60] sm:$0xff] }
  0x45   :  { %2025 = vmatpush3.msra.mxu1 %v180_v21  ;;  %2276 = vmatprep.subr.mxu0 %v2734_v33  ;;  %v322_v59 = vld [vmem:[#allocation5 + $0x70] sm:$0xff]  ;;  %v319_v0 = vld [vmem:[#allocation5 + $0x58] sm:$0xff]  ;;  %v317_v3 = vld [vmem:[#allocation5 + $0x48] sm:$0xff] }
  0x46   :  { %2026 = vmatprep.subr.mxu1 %v195_v22  ;;  %2277 = vmatpush3.msra.mxu0 %v2836_v40  ;;  %v318_v1 = vld [vmem:[#allocation5 + $0x50] sm:$0xff]  ;;  %v316_v5 = vld [vmem:[#allocation5 + $0x40] sm:$0xff]  ;;  %v315_v6 = vld [vmem:[#allocation5 + $0x38] sm:$0xff] }
  0x47   :  { %2027 = vmatpush3.msra.mxu1 %v179_v23  ;;  %2278 = vmatprep.subr.mxu0 %v2734_v33  ;;  %v314_v7 = vld [vmem:[#allocation5 + $0x30] sm:$0xff]  ;;  %v313_v9 = vld [vmem:[#allocation5 + $0x28] sm:$0xff]  ;;  %v312_v10 = vld [vmem:[#allocation5 + $0x20] sm:$0xff] }
  0x48   :  { %2028 = vmatprep.subr.mxu1 %v194_v24  ;;  %2279 = vmatpush3.msra.mxu0 %v2840_v43  ;;  %v2908_v12 = vld [vmem:[#allocation7 + $0x28] sm:$0xff]  ;;  %v311_v13 = vld [vmem:[#allocation5 + $0x18] sm:$0xff]  ;;  %v2912_v14 = vld [vmem:[#allocation7 + $0x20] sm:$0xff] }
  0x49   :  { %2029 = vmatpush3.msra.mxu1 %v178_v25  ;;  %2280 = vmatprep.subr.mxu0 %v2734_v33  ;;  %v310_v15 = vld [vmem:[#allocation5 + $0x10] sm:$0xff]  ;;  %v2916_v16 = vld [vmem:[#allocation7 + $0x18] sm:$0xff]  ;;  %v309_v17 = vld [vmem:[#allocation5 + $0x8] sm:$0xff] }
  0x4a   :  { %2030 = vmatprep.subr.mxu1 %v193_v26  ;;  %2281 = vmatpush3.msra.mxu0 %v2844_v46  ;;  %v2920_v18 = vld [vmem:[#allocation7 + $0x10] sm:$0xff]  ;;  %v308_v19 = vld [vmem:[#allocation5] sm:$0xff]  ;;  %v2924_v20 = vld [vmem:[#allocation7 + $0x8] sm:$0xff] }
  0x4b   :  { %2031 = vmatpush3.msra.mxu1 %v177_v27  ;;  %2282 = vmatprep.subr.mxu0 %v2734_v33  ;;  %v2928_v21 = vld [vmem:[#allocation7] sm:$0xff] }
  0x4c   :  { %2032 = vmatprep.subr.mxu1 %v192_v28  ;;  %2283 = vmatpush3.msra.mxu0 %v2848_v48  ;;  %v452_v22 = vld [vmem:[%s3499_s2] sm:$0xff] }
  0x4d   :  { %2033 = vmatpush3.msra.mxu1 %v176_v29  ;;  %2284 = vmatprep.subr.mxu0 %v2734_v33 }
  0x4e   :  { %2034 = vmatprep.subr.mxu1 %v191_v31  ;;  %2285 = vmatpush3.msra.mxu0 %v2852_v49 }
  0x4f   :  { %2035 = vmatpush3.msra.mxu1 %v175_v32  ;;  %2286 = vmatprep.subr.mxu0 %v2734_v33 }
  0x50   :  { %2036 = vmatprep.subr.mxu1 %v190_v34  ;;  %2287 = vmatpush3.msra.mxu0 %v2856_v50 }
  0x51   :  { %2037 = vmatpush3.msra.mxu1 %v174_v35  ;;  %2288 = vmatprep.subr.mxu0 %v2734_v33 }
  0x52   :  { %2038 = vmatprep.subr.mxu1 %v189_v37  ;;  %2289 = vmatpush3.msra.mxu0 %v2860_v51 }
  0x53   :  { %2039 = vmatpush3.msra.mxu1 %v173_v39  ;;  %2290 = vmatprep.subr.mxu0 %v2734_v33 }
  0x54   :  { %2040 = vmatprep.subr.mxu1 %v188_v41  ;;  %2291 = vmatpush3.msra.mxu0 %v2864_v52 }
  0x55   :  { %2041 = vmatpush3.msra.mxu1 %v172_v42  ;;  %2292 = vmatprep.subr.mxu0 %v2734_v33 }
  0x56   :  { %2042 = vmatprep.subr.mxu1 %v187_v44  ;;  %2293 = vmatpush3.msra.mxu0 %v2908_v12 }
  0x57   :  { %2043 = vmatpush3.msra.mxu1 %v171_v45  ;;  %2294 = vmatprep.subr.mxu0 %v2734_v33 }
  0x58   :  { %2228 = vmatprep.subr.mxu1 %v323_v47  ;;  %2295 = vmatpush3.msra.mxu0 %v2912_v14 }
  0x59   :  { %2296 = vmatprep.subr.mxu0 %v2734_v33 }
  0x5a   :  { %2297 = vmatpush3.msra.mxu0 %v2916_v16 }
  0x5b   :  { %2298 = vmatprep.subr.mxu0 %v2734_v33 }
  0x5c   :  { %2299 = vmatpush3.msra.mxu0 %v2920_v18 }
  0x5d   :  { %2300 = vmatprep.subr.mxu0 %v2734_v33 }
  0x5e   :  { %2301 = vmatpush3.msra.mxu0 %v2924_v20 }
  0x5f   :  { %2302 = vmatprep.subr.mxu0 %v2734_v33 }
  0x60   :  { %2303 = vmatpush3.msra.mxu0 %v2928_v21 }
  0x61   :  { %2342 = vmatprep.subr.mxu0 %v2734_v33 }
  0xb0   :  { %v101_v56 = vpop.permute.xlu0 %100  ;;  %v107_v57 = vpop.permute.xlu1 %106 }
  0xb1   :  { %vm123_vm0 = vcmp.eq.s32.totalorder %v101_v56, %v2871_v54  ;;  %vm124_vm1 = vcmp.eq.s32.totalorder %v101_v56, %v2874_v55  ;;  %vm128_vm4 = vcmp.eq.s32.totalorder %v107_v57, %v2874_v55  ;;  %vm127_vm5 = vcmp.eq.s32.totalorder %v107_v57, %v2871_v54 }
  0xb2   :  { %1995 = vmatprep.mubr.msk.f32.mxu1 %vm124_vm1, %v2735_v58  ;;  %vm1710_vm1 = vcmask 1040384  }
  0xb3   :  { %1996 = vmatmul.mubr.msk.f32.vlgmr.msra.gmra.mxu1 %vm123_vm0, %v2735_v58  ;;  %vm2736_vm0 = vmmov 0  }
  0xb4   :  { %v104_v60 = vpop.permute.xlu0 %103  ;;  %2229 = vmatpush3.msra.mxu1 %v323_v47  ;;  %v110_v62 = vpop.permute.xlu1 %109  ;;  %2304 = vmatprep.mubr.msk.f32.mxu0 %vm2736_vm0, %v2734_v33 }
  0xb5   :  { %vm125_vm2 = vcmp.eq.s32.totalorder %v104_v60, %v2871_v54  ;;  %vm126_vm3 = vcmp.eq.s32.totalorder %v104_v60, %v2874_v55  ;;  %2230 = vmatprep.subr.mxu1 %v322_v59  ;;  %vm130_vm6 = vcmp.eq.s32.totalorder %v110_v62, %v2874_v55  ;;  %vm129_vm7 = vcmp.eq.s32.totalorder %v110_v62, %v2871_v54 }
  0xb6   :  { %1997 = vmatprep.mubr.msk.f32.mxu1 %vm126_vm3, %v2735_v58  ;;  %2231 = vmatpush3.msra.mxu1 %v322_v59  ;;  %vm1728_vm3 = vcmask 1042432  }
  0xb7   :  { %1998 = vmatmul.mubr.msk.f32.gmra.mxu1 %vm125_vm2, %v2735_v58  ;;  %2232 = vmatprep.subr.mxu1 %v321_v61  ;;  %vm1719_vm2 = vcmask 1041408  }
  0xb8   :  { %1999 = vmatprep.mubr.msk.f32.mxu1 %vm128_vm4, %v2735_v58  ;;  %2233 = vmatpush3.msra.mxu1 %v321_v61  ;;  %v113_v2 = vpop.permute.xlu0 %112  ;;  %v116_v4 = vpop.permute.xlu1 %115  ;;  %v3009_v61 = vld [vmem:[%s3502_s5] ss:$0 sm:$0xff]  ;;  %vm1737_vm4 = vcmask 1043456   ;;  %s2738_s5 = smov [#allocation11]  }
  0xb9   :  { %2234 = vmatprep.subr.mxu1 %v320_v63  ;;  %vm132_vm8 = vcmp.eq.s32.totalorder %v113_v2, %v2874_v55  ;;  %vm134_vm9 = vcmp.eq.s32.totalorder %v116_v4, %v2874_v55  ;;  %vm131_vm10 = vcmp.eq.s32.totalorder %v113_v2, %v2871_v54  ;;  %vm133_vm11 = vcmp.eq.s32.totalorder %v116_v4, %v2871_v54  ;;  %s1964_s3 = sshll.u32 %s2738_s5, 4  ;;  %s1965_s3 = int_to_ptr.vmem [resolvable:$true] %s1964_s3 }
  0xba   :  { %2235 = vmatpush3.msra.mxu1 %v320_v63  ;;  %2305 = vmatmul.mubr.f32.vlgmr.msra.gmra.mxu0 %v452_v22  ;;  %s2675_s26 = scalar_lea.vmem %s1965_s3, 128  ;;  %p2680_p7 = scmp.lt.s32.totalorder %s1965_s3, %s1965_s3 }
  0xbb   :  { %2000 = vmatmul.mubr.msk.f32.gmra.mxu1 %vm127_vm5, %v2735_v58  ;;  %2236 = vmatprep.subr.mxu1 %v319_v0  ;;  %vm1746_vm5 = vcmask 1044480   ;;  %p2676_p6 = scmp.ne.s32.totalorder %s1965_s3, %s2675_s26  ;;  %p2681_p8 = scmp.lt.s32.totalorder %s2675_s26, %s2675_s26 }
  0xbc   :  { %2001 = vmatprep.mubr.msk.f32.mxu1 %vm130_vm6, %v2735_v58  ;;  %2237 = vmatpush3.msra.mxu1 %v319_v0  ;;  %v119_v8 = vpop.permute.xlu0 %118  ;;  %vm1755_vm6 = vcmask 1045504  }
  0xbd   :  { %2238 = vmatprep.subr.mxu1 %v318_v1  ;;  %vm136_vm12 = vcmp.eq.s32.totalorder %v119_v8, %v2874_v55  ;;  %v122_v11 = vpop.permute.xlu1 %121  ;;  %vm135_vm14 = vcmp.eq.s32.totalorder %v119_v8, %v2871_v54  ;;  %2343 = vmatpush3.msra.mxu0 %v2830_v36  ;;  %p2682_p9 = por %p2681_p8, %p2680_p7 }
  0xbe   :  { %2239 = vmatpush3.msra.mxu1 %v318_v1  ;;  %vm138_vm13 = vcmp.eq.s32.totalorder %v122_v11, %v2874_v55  ;;  %vm137_vm15 = vcmp.eq.s32.totalorder %v122_v11, %v2871_v54  ;;  %2374 = vmatprep.mubr.msk.f32.mxu0 %vm2736_vm0, %v2734_v33 }
  0xbf   :  { %2002 = vmatmul.mubr.msk.f32.gmra.mxu1 %vm129_vm7, %v2735_v58  ;;  %2240 = vmatprep.subr.mxu1 %v317_v3  ;;  %vm1764_vm7 = vcmask 1046528   ;;  %p2683_p10 = pnand %p2682_p9, %p2676_p6 }
  0xc0   :  { %2003 = vmatprep.mubr.msk.f32.mxu1 %vm132_vm8, %v2735_v58  ;;  %2241 = vmatpush3.msra.mxu1 %v317_v3 }
  0xc1   :  { %2242 = vmatprep.subr.mxu1 %v316_v5  ;;  %2344 = vmatprep.subr.mxu0 %v2734_v33 }
  0xc2   :  { %2243 = vmatpush3.msra.mxu1 %v316_v5  ;;  %2345 = vmatpush3.msra.mxu0 %v2833_v38 }
  0xc3   :  { %2004 = vmatmul.mubr.msk.f32.gmra.mxu1 %vm131_vm10, %v2735_v58  ;;  %2244 = vmatprep.subr.mxu1 %v315_v6 }
  0xc4   :  { %2005 = vmatprep.mubr.msk.f32.mxu1 %vm134_vm9, %v2735_v58  ;;  %2245 = vmatpush3.msra.mxu1 %v315_v6 }
  0xc5   :  { %2246 = vmatprep.subr.mxu1 %v314_v7  ;;  %2346 = vmatprep.subr.mxu0 %v2734_v33 }
  0xc6   :  { %2247 = vmatpush3.msra.mxu1 %v314_v7  ;;  %2347 = vmatpush3.msra.mxu0 %v2836_v40 }
  0xc7   :  { %2006 = vmatmul.mubr.msk.f32.gmra.mxu1 %vm133_vm11, %v2735_v58  ;;  %2248 = vmatprep.subr.mxu1 %v313_v9 }
  0xc8   :  { %2007 = vmatprep.mubr.msk.f32.mxu1 %vm136_vm12, %v2735_v58  ;;  %2249 = vmatpush3.msra.mxu1 %v313_v9 }
  0xc9   :  { %2250 = vmatprep.subr.mxu1 %v312_v10  ;;  %2348 = vmatprep.subr.mxu0 %v2734_v33 }
  0xca   :  { %2251 = vmatpush3.msra.mxu1 %v312_v10  ;;  %2349 = vmatpush3.msra.mxu0 %v2840_v43 }
  0xcb   :  { %2008 = vmatmul.mubr.msk.f32.gmra.mxu1 %vm135_vm14, %v2735_v58  ;;  %2252 = vmatprep.subr.mxu1 %v311_v13 }
  0xcc   :  { %2009 = vmatprep.mubr.msk.f32.mxu1 %vm138_vm13, %v2735_v58  ;;  %2253 = vmatpush3.msra.mxu1 %v311_v13 }
  0xcd   :  { %2254 = vmatprep.subr.mxu1 %v310_v15  ;;  %2350 = vmatprep.subr.mxu0 %v2734_v33 }
  0xce   :  { %2255 = vmatpush3.msra.mxu1 %v310_v15  ;;  %2351 = vmatpush3.msra.mxu0 %v2844_v46 }
  0xcf   :  { %2010 = vmatmul.mubr.msk.f32.gmra.mxu1 %vm137_vm15, %v2735_v58  ;;  %2256 = vmatprep.subr.mxu1 %v309_v17 }
  0xd0   :  { %2257 = vmatpush3.msra.mxu1 %v309_v17  ;;  %2352 = vmatprep.subr.mxu0 %v2734_v33  ;;  %v2737_v17 = vmov 1966171168  }
  0xd1   :  { %2258 = vmatprep.subr.mxu1 %v308_v19  ;;  %2353 = vmatpush3.msra.mxu0 %v2848_v48 }
  0xd2   :  { %2259 = vmatpush3.msra.mxu1 %v308_v19  ;;  %2354 = vmatprep.subr.mxu0 %v2734_v33  ;;  %v1025_v19 = vunpack.c.l.s4 %v2737_v17 }
  0xd3   :  { %2307 = vmatprep.subr.mxu1 %v2734_v33  ;;  %2355 = vmatpush3.msra.mxu0 %v2852_v49 }
  0xd4   :  { %2356 = vmatprep.subr.mxu0 %v2734_v33 }
  0xd5   :  { %2357 = vmatpush3.msra.mxu0 %v2856_v50 }
  0xd6   :  { %2358 = vmatprep.subr.mxu0 %v2734_v33 }
  0xd7   :  { %2359 = vmatpush3.msra.mxu0 %v2860_v51 }
  0xd8   :  { %2360 = vmatprep.subr.mxu0 %v2734_v33 }
  0xd9   :  { %2361 = vmatpush3.msra.mxu0 %v2864_v52 }
  0xda   :  { %2362 = vmatprep.subr.mxu0 %v2734_v33 }
  0xdb   :  { %2363 = vmatpush3.msra.mxu0 %v2908_v12 }
  0xdc   :  { %2364 = vmatprep.subr.mxu0 %v2734_v33 }
  0xdd   :  { %2365 = vmatpush3.msra.mxu0 %v2912_v14 }
  0xde   :  { %2366 = vmatprep.subr.mxu0 %v2734_v33 }
  0xdf   :  { %2367 = vmatpush3.msra.mxu0 %v2916_v16 }
  0xe0   :  { %2368 = vmatprep.subr.mxu0 %v2734_v33 }
  0xe1   :  { %2369 = vmatpush3.msra.mxu0 %v2920_v18 }
  0xe2   :  { %2370 = vmatprep.subr.mxu0 %v2734_v33 }
  0xe3   :  { %2371 = vmatpush3.msra.mxu0 %v2924_v20 }
  0xe4   :  { %2372 = vmatprep.subr.mxu0 %v2734_v33 }
  0xe5   :  { %2373 = vmatpush3.msra.mxu0 %v2928_v21 }
  0xe6   :  { %2412 = vmatprep.subr.mxu0 %v2734_v33 }
 0x173   :  { %v2044_v23 = vpop.f32.mrf.mxu1 }
 0x175   :  { %v2045_v24 = vpop.f32.mrf.mxu1 }
 0x176   :  { %v2046_v25 = vadd.f32 %v2045_v24, %v2044_v23 }
 0x177   :  { %v2047_v26 = vpop.f32.mrf.mxu1 }
 0x178   :  { %2260 = vmatprep.mubr.f32.mxu1 %v2046_v25  ;;  %v1026_v25 = vunpack.c.0.s8 %v1025_v19 }
 0x179   :  { %v2048_v27 = vpop.f32.mrf.mxu1 }
 0x17a   :  { %v2049_v28 = vadd.f32 %v2048_v27, %v2047_v26  ;;  %v519_v59 = vpop.f32.mrf.mxu0  ;;  %v3065_v26 = vshrl.u32 %v96_v53, 7 }
 0x17b   :  { %v2050_v29 = vpop.f32.mrf.mxu1 }
 0x17c   :  { %2261 = vmatmul.mubr.f32.vlgmr.msra.gmra.mxu1 %v2049_v28  ;;  %v2306_v60 = vpop.f32.mrf.mxu0  ;;  %v3068_v28 = vsub.s32 %v1026_v25, %v3065_v26 }
 0x17d   :  { %v2051_v30 = vpop.f32.mrf.mxu1  ;;  %2308 = vmatpush3.msra.mxu1 %v2830_v36 }
 0x17e   :  { %v2052_v31 = vadd.f32 %v2051_v30, %v2050_v29  ;;  %2309 = vmatprep.subr.mxu1 %v2734_v33 }
 0x17f   :  { %v2053_v32 = vpop.f32.mrf.mxu1  ;;  %2310 = vmatpush3.msra.mxu1 %v2833_v38 }
 0x180   :  { %2263 = vmatprep.mubr.f32.mxu1 %v2052_v31  ;;  %2311 = vmatprep.subr.mxu1 %v2734_v33 }
 0x181   :  { %v2054_v34 = vpop.f32.mrf.mxu1  ;;  %2312 = vmatpush3.msra.mxu1 %v2836_v40 }
 0x182   :  { %v2055_v35 = vadd.f32 %v2054_v34, %v2053_v32  ;;  %2313 = vmatprep.subr.mxu1 %v2734_v33 }
 0x183   :  { %v2056_v37 = vpop.f32.mrf.mxu1  ;;  %2314 = vmatpush3.msra.mxu1 %v2840_v43 }
 0x184   :  { %2264 = vmatmul.mubr.f32.gmra.mxu1 %v2055_v35  ;;  %2315 = vmatprep.subr.mxu1 %v2734_v33  ;;  %v3073_v35 = vsub.s32 0, %v3065_v26 }
 0x185   :  { %v2057_v39 = vpop.f32.mrf.mxu1  ;;  %2316 = vmatpush3.msra.mxu1 %v2844_v46 }
 0x186   :  { %v2058_v41 = vadd.f32 %v2057_v39, %v2056_v37  ;;  %2317 = vmatprep.subr.mxu1 %v2734_v33 }
 0x187   :  { %v2059_v42 = vpop.f32.mrf.mxu1  ;;  %2318 = vmatpush3.msra.mxu1 %v2848_v48 }
 0x188   :  { %2266 = vmatprep.mubr.f32.mxu1 %v2058_v41  ;;  %2319 = vmatprep.subr.mxu1 %v2734_v33 }
 0x189   :  { %v2060_v44 = vpop.f32.mrf.mxu1  ;;  %2320 = vmatpush3.msra.mxu1 %v2852_v49 }
 0x18a   :  { %v2061_v45 = vadd.f32 %v2060_v44, %v2059_v42  ;;  %2321 = vmatprep.subr.mxu1 %v2734_v33 }
 0x18b   :  { %v2062_v47 = vpop.f32.mrf.mxu1  ;;  %2322 = vmatpush3.msra.mxu1 %v2856_v50 }
 0x18c   :  { %2267 = vmatmul.mubr.f32.gmra.mxu1 %v2061_v45  ;;  %2323 = vmatprep.subr.mxu1 %v2734_v33 }
 0x18d   :  { %v2063_v54 = vpop.f32.mrf.mxu1  ;;  %2324 = vmatpush3.msra.mxu1 %v2860_v51 }
 0x18e   :  { %v2064_v55 = vadd.f32 %v2063_v54, %v2062_v47  ;;  %2325 = vmatprep.subr.mxu1 %v2734_v33 }
 0x18f   :  { %v2065_v56 = vpop.f32.mrf.mxu1  ;;  %2326 = vmatpush3.msra.mxu1 %v2864_v52 }
 0x190   :  { %2269 = vmatprep.mubr.f32.mxu1 %v2064_v55  ;;  %2327 = vmatprep.subr.mxu1 %v2734_v33 }
 0x191   :  { %v2066_v57 = vpop.f32.mrf.mxu1  ;;  %2328 = vmatpush3.msra.mxu1 %v2908_v12 }
 0x192   :  { %v2067_v58 = vadd.f32 %v2066_v57, %v2065_v56  ;;  %2329 = vmatprep.subr.mxu1 %v2734_v33 }
 0x193   :  { %2330 = vmatpush3.msra.mxu1 %v2912_v14 }
 0x194   :  { %2270 = vmatmul.mubr.f32.gmra.mxu1 %v2067_v58  ;;  %2331 = vmatprep.subr.mxu1 %v2734_v33 }
 0x195   :  { %2332 = vmatpush3.msra.mxu1 %v2916_v16  ;;  %2339 = vmatprep.mubr.msk.f32.mxu1 %vm2736_vm0, %v2734_v33 }
 0x196   :  { %2333 = vmatprep.subr.mxu1 %v2734_v33 }
 0x197   :  { %2334 = vmatpush3.msra.mxu1 %v2920_v18 }
 0x198   :  { %2335 = vmatprep.subr.mxu1 %v2734_v33 }
 0x199   :  { %2336 = vmatpush3.msra.mxu1 %v2924_v20 }
 0x19a   :  { %2337 = vmatprep.subr.mxu1 %v2734_v33 }
 0x19b   :  { %2338 = vmatpush3.msra.mxu1 %v2928_v21 }
 0x19c   :  { %2377 = vmatprep.subr.mxu1 %v2734_v33 }
 0x23c   :  { %v2262_v62 = vpop.f32.mrf.mxu1 }
 0x23d   :  { %v403_v63 = vadd.f32 %v2262_v62, %v3009_v61 }
 0x23e   :  { %v397_v0 = vpop.f32.mrf.mxu1 }
 0x23f   :  { %v398_v1 = vadd.f32 %v3009_v61, %v397_v0 }
 0x241   :  { %v520_v2 = vadd.f32 %v519_v59, %v398_v1 }
 0x243   :  { %2569 = vtanh.f32 %v520_v2 }
 0x244   :  { %v2265_v3 = vpop.f32.mrf.mxu1 }
 0x245   :  { %v3014_v4 = vadd.f32 %v2265_v3, %v3009_v61 }
 0x246   :  { %v407_v5 = vpop.f32.mrf.mxu1 }
 0x247   :  { %v3017_v6 = vadd.f32 %v3009_v61, %v407_v5 }
 0x24c   :  { %v2268_v7 = vpop.f32.mrf.mxu1 }
 0x24d   :  { %v3020_v8 = vadd.f32 %v2268_v7, %v3009_v61 }
 0x24e   :  { %v417_v9 = vpop.f32.mrf.mxu1 }
 0x24f   :  { %v3023_v10 = vadd.f32 %v3009_v61, %v417_v9 }
 0x250   :  { %v2570_v11 = vpop.eup %2569 }
 0x251   :  { %2340 = vmatmul.mubr.f32.vlgmr.msra.gmra.mxu1 %v2570_v11  ;;  %v1030_v29 = vrot.slane %v2570_v11, %v3068_v28  ;;  %v1023_v30 = vcombine.high %v2570_v11, %v2570_v11 }
 0x252   :  { %2378 = vmatpush3.msra.mxu1 %v2830_v36  ;;  %2409 = vmatprep.mubr.msk.f32.mxu1 %vm2736_vm0, %v2734_v33 }
 0x253   :  { %2379 = vmatprep.subr.mxu1 %v2734_v33  ;;  %v1038_v31 = vcombine.high %v1030_v29, %v1030_v29  ;;  %v1037_v34 = vrot.slane %v1023_v30, %v3068_v28  ;;  %v1046_v39 = vrot.slane %v1030_v29, %v3068_v28 }
 0x254   :  { %v2271_v13 = vpop.f32.mrf.mxu1  ;;  %2380 = vmatpush3.msra.mxu1 %v2833_v38 }
 0x255   :  { %v3031_v15 = vadd.f32 %v2271_v13, %v3009_v61  ;;  %2381 = vmatprep.subr.mxu1 %v2734_v33  ;;  %v1060_v41 = vrot.slane %v1038_v31, %v3068_v28  ;;  %v1053_v47 = vrot.slane %v1037_v34, %v3068_v28  ;;  %v1039_v54 = vcombine.high %v1037_v34, %v1037_v34 }
 0x256   :  { %2382 = vmatpush3.msra.mxu1 %v2836_v40  ;;  %v3062_v22 = vpop.f32.mrf.mxu1  ;;  %v1068_v59 = vcombine.high %v1046_v39, %v1046_v39 }
 0x257   :  { %2383 = vmatprep.subr.mxu1 %v2734_v33  ;;  %v1070_v60 = vcombine.high %v1060_v41, %v1060_v41  ;;  %v1067_v5 = vrot.slane %v1039_v54, %v3068_v28  ;;  %v1069_v19 = vcombine.high %v1053_v47, %v1053_v47 }
 0x258   :  { %2384 = vmatpush3.msra.mxu1 %v2840_v43 }
 0x259   :  { %2385 = vmatprep.subr.mxu1 %v2734_v33 }
 0x25a   :  { %2386 = vmatpush3.msra.mxu1 %v2844_v46 }
 0x25b   :  { %2387 = vmatprep.subr.mxu1 %v2734_v33 }
 0x25c   :  { %2388 = vmatpush3.msra.mxu1 %v2848_v48 }
 0x25d   :  { %2389 = vmatprep.subr.mxu1 %v2734_v33 }
 0x25e   :  { %2390 = vmatpush3.msra.mxu1 %v2852_v49 }
 0x25f   :  { %2391 = vmatprep.subr.mxu1 %v2734_v33 }
 0x260   :  { %2392 = vmatpush3.msra.mxu1 %v2856_v50 }
 0x261   :  { %2393 = vmatprep.subr.mxu1 %v2734_v33 }
 0x262   :  { %2394 = vmatpush3.msra.mxu1 %v2860_v51 }
 0x263   :  { %2395 = vmatprep.subr.mxu1 %v2734_v33 }
 0x264   :  { %2396 = vmatpush3.msra.mxu1 %v2864_v52 }
 0x265   :  { %2397 = vmatprep.subr.mxu1 %v2734_v33 }
 0x266   :  { %2398 = vmatpush3.msra.mxu1 %v2908_v12 }
 0x267   :  { %2399 = vmatprep.subr.mxu1 %v2734_v33 }
 0x268   :  { %2400 = vmatpush3.msra.mxu1 %v2912_v14 }
 0x269   :  { %2401 = vmatprep.subr.mxu1 %v2734_v33 }
 0x26a   :  { %2402 = vmatpush3.msra.mxu1 %v2916_v16 }
 0x26b   :  { %2403 = vmatprep.subr.mxu1 %v2734_v33 }
 0x26c   :  { %2404 = vmatpush3.msra.mxu1 %v2920_v18 }
 0x26d   :  { %2405 = vmatprep.subr.mxu1 %v2734_v33 }
 0x26e   :  { %2406 = vmatpush3.msra.mxu1 %v2924_v20 }
 0x26f   :  { %2407 = vmatprep.subr.mxu1 %v2734_v33 }
 0x270   :  { %2408 = vmatpush3.msra.mxu1 %v2928_v21 }
 0x271   :  { %2447 = vmatprep.subr.mxu1 %v2734_v33 }
 0x311   :  { %v590_v23 = vpop.f32.mrf.mxu1 }
 0x312   :  { %v591_v24 = vadd.f32 %v590_v23, %v403_v63 }
 0x313   :  { %v2341_v27 = vpop.f32.mrf.mxu1 }
 0x314   :  { %2571 = vtanh.f32 %v591_v24 }
 0x321   :  { %v2572_v32 = vpop.eup %2571 }
 0x322   :  { %2375 = vmatmul.mubr.f32.vlgmr.msra.gmra.mxu0 %v2572_v32  ;;  %v1088_v37 = vrot.slane %v2572_v32, %v3068_v28  ;;  %v1081_v53 = vcombine.high %v2572_v32, %v2572_v32  ;;  %v1071_v32 = vcombine.high %v1067_v5, %v1067_v5 }
 0x323   :  { %2413 = vmatpush3.msra.mxu0 %v2830_v36  ;;  %2444 = vmatprep.mubr.msk.f32.mxu0 %vm2736_vm0, %v2734_v33 }
 0x324   :  { %2414 = vmatprep.subr.mxu0 %v2734_v33  ;;  %v1104_v42 = vrot.slane %v1088_v37, %v3068_v28  ;;  %v1096_v44 = vcombine.high %v1088_v37, %v1088_v37  ;;  %v1095_v45 = vrot.slane %v1081_v53, %v3068_v28 }
 0x325   :  { %2415 = vmatpush3.msra.mxu0 %v2833_v38 }
 0x326   :  { %2416 = vmatprep.subr.mxu0 %v2734_v33  ;;  %v1433_v55 = vrot.slane %v1104_v42, %v3073_v35  ;;  %v1118_v56 = vrot.slane %v1096_v44, %v3068_v28  ;;  %v1126_v57 = vcombine.high %v1104_v42, %v1104_v42  ;;  %v1111_v58 = vrot.slane %v1095_v45, %v3068_v28 }
 0x327   :  { %2417 = vmatpush3.msra.mxu0 %v2836_v40  ;;  %v1097_v62 = vcombine.high %v1095_v45, %v1095_v45 }
 0x328   :  { %2418 = vmatprep.subr.mxu0 %v2734_v33  ;;  %v3093_v63 = vsel %vm1710_vm1, %v1046_v39, %v1433_v55  ;;  %v1437_v0 = vrot.slane %v1118_v56, %v3073_v35  ;;  %v1441_v1 = vrot.slane %v1126_v57, %v3073_v35  ;;  %v1128_v2 = vcombine.high %v1118_v56, %v1118_v56 }
 0x329   :  { %2419 = vmatpush3.msra.mxu0 %v2840_v43  ;;  %v1449_v3 = vrot.slane %v1111_v58, %v3073_v35  ;;  %v1125_v7 = vrot.slane %v1097_v62, %v3068_v28  ;;  %v1127_v9 = vcombine.high %v1111_v58, %v1111_v58 }
 0x32a   :  { %2420 = vmatprep.subr.mxu0 %v2734_v33  ;;  %v3103_v11 = vsel %vm1710_vm1, %v1060_v41, %v1437_v0  ;;  %v3106_v13 = vsel %vm1710_vm1, %v1068_v59, %v1441_v1  ;;  %v1445_v17 = vrot.slane %v1128_v2, %v3073_v35 }
 0x32b   :  { %2421 = vmatpush3.msra.mxu0 %v2844_v46  ;;  %v3111_v23 = vsel %vm1710_vm1, %v1053_v47, %v1449_v3  ;;  %v1453_v24 = vrot.slane %v1125_v7, %v3073_v35  ;;  %v1457_v25 = vrot.slane %v1127_v9, %v3073_v35  ;;  %v1129_v27 = vcombine.high %v1125_v7, %v1125_v7 }
 0x32c   :  { %2422 = vmatprep.subr.mxu0 %v2734_v33  ;;  %v3117_v29 = vsel %vm1710_vm1, %v1070_v60, %v1445_v17 }
 0x32d   :  { %2423 = vmatpush3.msra.mxu0 %v2848_v48  ;;  %v3121_v30 = vsel %vm1710_vm1, %v1067_v5, %v1453_v24  ;;  %v3124_v31 = vsel %vm1710_vm1, %v1069_v19, %v1457_v25  ;;  %v1461_v34 = vrot.slane %v1129_v27, %v3073_v35 }
 0x32e   :  { %2424 = vmatprep.subr.mxu0 %v2734_v33 }
 0x32f   :  { %2425 = vmatpush3.msra.mxu0 %v2852_v49  ;;  %v3130_v37 = vsel %vm1710_vm1, %v1071_v32, %v1461_v34 }
 0x330   :  { %2426 = vmatprep.subr.mxu0 %v2734_v33 }
 0x331   :  { %2427 = vmatpush3.msra.mxu0 %v2856_v50 }
 0x332   :  { %2428 = vmatprep.subr.mxu0 %v2734_v33 }
 0x333   :  { %2429 = vmatpush3.msra.mxu0 %v2860_v51 }
 0x334   :  { %2430 = vmatprep.subr.mxu0 %v2734_v33 }
 0x335   :  { %2431 = vmatpush3.msra.mxu0 %v2864_v52 }
 0x336   :  { %2432 = vmatprep.subr.mxu0 %v2734_v33 }
 0x337   :  { %2433 = vmatpush3.msra.mxu0 %v2908_v12 }
 0x338   :  { %2434 = vmatprep.subr.mxu0 %v2734_v33 }
 0x339   :  { %2435 = vmatpush3.msra.mxu0 %v2912_v14 }
 0x33a   :  { %2436 = vmatprep.subr.mxu0 %v2734_v33 }
 0x33b   :  { %2437 = vmatpush3.msra.mxu0 %v2916_v16 }
 0x33c   :  { %2438 = vmatprep.subr.mxu0 %v2734_v33 }
 0x33d   :  { %2439 = vmatpush3.msra.mxu0 %v2920_v18 }
 0x33e   :  { %2440 = vmatprep.subr.mxu0 %v2734_v33 }
 0x33f   :  { %2441 = vmatpush3.msra.mxu0 %v2924_v20 }
 0x340   :  { %2442 = vmatprep.subr.mxu0 %v2734_v33 }
 0x341   :  { %2443 = vmatpush3.msra.mxu0 %v2928_v21 }
 0x342   :  { %2482 = vmatprep.subr.mxu0 %v2734_v33 }
 0x3e2   :  { %v661_v53 = vpop.f32.mrf.mxu0 }
 0x3e3   :  { %v662_v39 = vadd.f32 %v661_v53, %v3017_v6 }
 0x3e4   :  { %v2376_v41 = vpop.f32.mrf.mxu0 }
 0x3e5   :  { %2573 = vtanh.f32 %v662_v39 }
 0x3f2   :  { %v2574_v42 = vpop.eup %2573 }
 0x3f3   :  { %2410 = vmatmul.mubr.f32.vlgmr.msra.gmra.mxu1 %v2574_v42  ;;  %v1138_v44 = vrot.slane %v2574_v42, %v3068_v28  ;;  %v1131_v45 = vcombine.high %v2574_v42, %v2574_v42 }
 0x3f4   :  { %2448 = vmatpush3.msra.mxu1 %v2830_v36  ;;  %2479 = vmatprep.mubr.msk.f32.mxu1 %vm2736_vm0, %v2734_v33 }
 0x3f5   :  { %2449 = vmatprep.subr.mxu1 %v2734_v33  ;;  %v1154_v47 = vrot.slane %v1138_v44, %v3068_v28  ;;  %v1146_v54 = vcombine.high %v1138_v44, %v1138_v44  ;;  %v1145_v55 = vrot.slane %v1131_v45, %v3068_v28 }
 0x3f6   :  { %2450 = vmatpush3.msra.mxu1 %v2833_v38 }
 0x3f7   :  { %2451 = vmatprep.subr.mxu1 %v2734_v33  ;;  %v1473_v6 = vrot.slane %v1154_v47, %v3073_v35  ;;  %v1168_v56 = vrot.slane %v1146_v54, %v3068_v28  ;;  %v1176_v57 = vcombine.high %v1154_v47, %v1154_v47  ;;  %v1161_v58 = vrot.slane %v1145_v55, %v3068_v28 }
 0x3f8   :  { %2452 = vmatpush3.msra.mxu1 %v2836_v40  ;;  %v1147_v59 = vcombine.high %v1145_v55, %v1145_v55 }
 0x3f9   :  { %2453 = vmatprep.subr.mxu1 %v2734_v33  ;;  %v3168_v60 = vsel %vm1719_vm2, %v3093_v63, %v1473_v6  ;;  %v1477_v62 = vrot.slane %v1168_v56, %v3073_v35  ;;  %v1481_v0 = vrot.slane %v1176_v57, %v3073_v35  ;;  %v1178_v1 = vcombine.high %v1168_v56, %v1168_v56 }
 0x3fa   :  { %2454 = vmatpush3.msra.mxu1 %v2840_v43  ;;  %v1489_v2 = vrot.slane %v1161_v58, %v3073_v35  ;;  %v1175_v3 = vrot.slane %v1147_v59, %v3068_v28  ;;  %v1177_v5 = vcombine.high %v1161_v58, %v1161_v58 }
 0x3fb   :  { %2455 = vmatprep.subr.mxu1 %v2734_v33  ;;  %v3178_v7 = vsel %vm1719_vm2, %v3103_v11, %v1477_v62  ;;  %v3182_v63 = vsel %vm1719_vm2, %v3106_v13, %v1481_v0  ;;  %v1485_v9 = vrot.slane %v1178_v1, %v3073_v35 }
 0x3fc   :  { %2456 = vmatpush3.msra.mxu1 %v2844_v46  ;;  %v3188_v17 = vsel %vm1719_vm2, %v3111_v23, %v1489_v2  ;;  %v1493_v19 = vrot.slane %v1175_v3, %v3073_v35  ;;  %v1497_v24 = vrot.slane %v1177_v5, %v3073_v35  ;;  %v1179_v25 = vcombine.high %v1175_v3, %v1175_v3 }
 0x3fd   :  { %2457 = vmatprep.subr.mxu1 %v2734_v33  ;;  %v3195_v11 = vsel %vm1719_vm2, %v3117_v29, %v1485_v9  ;;  %v2585_v9 = vld [vmem:[#allocation7 + $0x78] sm:$0xff] }
 0x3fe   :  { %2458 = vmatpush3.msra.mxu1 %v2848_v48  ;;  %v3200_v13 = vsel %vm1719_vm2, %v3121_v30, %v1493_v19  ;;  %v3204_v23 = vsel %vm1719_vm2, %v3124_v31, %v1497_v24  ;;  %v1501_v27 = vrot.slane %v1179_v25, %v3073_v35 }
 0x3ff   :  { %2459 = vmatprep.subr.mxu1 %v2734_v33 }
 0x400   :  { %2460 = vmatpush3.msra.mxu1 %v2852_v49  ;;  %v3211_v29 = vsel %vm1719_vm2, %v3130_v37, %v1501_v27  ;;  %v2587_v27 = vld [vmem:[#allocation7 + $0x68] sm:$0xff] }
 0x401   :  { %2461 = vmatprep.subr.mxu1 %v2734_v33 }
 0x402   :  { %2462 = vmatpush3.msra.mxu1 %v2856_v50 }
 0x403   :  { %2463 = vmatprep.subr.mxu1 %v2734_v33 }
 0x404   :  { %2464 = vmatpush3.msra.mxu1 %v2860_v51 }
 0x405   :  { %2465 = vmatprep.subr.mxu1 %v2734_v33 }
 0x406   :  { %2466 = vmatpush3.msra.mxu1 %v2864_v52 }
 0x407   :  { %2467 = vmatprep.subr.mxu1 %v2734_v33 }
 0x408   :  { %2468 = vmatpush3.msra.mxu1 %v2908_v12 }
 0x409   :  { %2469 = vmatprep.subr.mxu1 %v2734_v33 }
 0x40a   :  { %2470 = vmatpush3.msra.mxu1 %v2912_v14 }
 0x40b   :  { %2471 = vmatprep.subr.mxu1 %v2734_v33 }
 0x40c   :  { %2472 = vmatpush3.msra.mxu1 %v2916_v16 }
 0x40d   :  { %2473 = vmatprep.subr.mxu1 %v2734_v33 }
 0x40e   :  { %2474 = vmatpush3.msra.mxu1 %v2920_v18 }
 0x40f   :  { %2475 = vmatprep.subr.mxu1 %v2734_v33 }
 0x410   :  { %2476 = vmatpush3.msra.mxu1 %v2924_v20 }
 0x411   :  { %2477 = vmatprep.subr.mxu1 %v2734_v33 }
 0x412   :  { %2478 = vmatpush3.msra.mxu1 %v2928_v21 }
 0x413   :  { %2517 = vmatprep.subr.mxu1 %v2734_v33 }
 0x4b3   :  { %v732_v30 = vpop.f32.mrf.mxu1 }
 0x4b4   :  { %v733_v31 = vadd.f32 %v732_v30, %v3014_v4 }
 0x4b5   :  { %v2411_v32 = vpop.f32.mrf.mxu1 }
 0x4b6   :  { %2575 = vtanh.f32 %v733_v31 }
 0x4c3   :  { %v2576_v34 = vpop.eup %2575 }
 0x4c4   :  { %2445 = vmatmul.mubr.f32.vlgmr.msra.gmra.mxu0 %v2576_v34  ;;  %v1188_v37 = vrot.slane %v2576_v34, %v3068_v28  ;;  %v1181_v53 = vcombine.high %v2576_v34, %v2576_v34 }
 0x4c5   :  { %2483 = vmatpush3.msra.mxu0 %v2830_v36  ;;  %2514 = vmatprep.mubr.msk.f32.mxu0 %vm2736_vm0, %v2734_v33 }
 0x4c6   :  { %2484 = vmatprep.subr.mxu0 %v2734_v33  ;;  %v1204_v39 = vrot.slane %v1188_v37, %v3068_v28  ;;  %v1196_v41 = vcombine.high %v1188_v37, %v1188_v37  ;;  %v1195_v42 = vrot.slane %v1181_v53, %v3068_v28  ;;  %v2588_v37 = vld [vmem:[#allocation7 + $0x60] sm:$0xff] }
 0x4c7   :  { %2485 = vmatpush3.msra.mxu0 %v2833_v38 }
 0x4c8   :  { %2486 = vmatprep.subr.mxu0 %v2734_v33  ;;  %v1513_v4 = vrot.slane %v1204_v39, %v3073_v35  ;;  %v1218_v44 = vrot.slane %v1196_v41, %v3068_v28  ;;  %v1226_v36 = vcombine.high %v1204_v39, %v1204_v39  ;;  %v1211_v45 = vrot.slane %v1195_v42, %v3068_v28 }
 0x4c9   :  { %2487 = vmatpush3.msra.mxu0 %v2836_v40  ;;  %v1197_v47 = vcombine.high %v1195_v42, %v1195_v42 }
 0x4ca   :  { %2488 = vmatprep.subr.mxu0 %v2734_v33  ;;  %v3249_v54 = vsel %vm1728_vm3, %v3168_v60, %v1513_v4  ;;  %v1517_v38 = vrot.slane %v1218_v44, %v3073_v35  ;;  %v1521_v55 = vrot.slane %v1226_v36, %v3073_v35  ;;  %v1228_v6 = vcombine.high %v1218_v44, %v1218_v44  ;;  %v2589_v36 = vld [vmem:[#allocation7 + $0x58] sm:$0xff] }
 0x4cb   :  { %2489 = vmatpush3.msra.mxu0 %v2840_v43  ;;  %v1529_v56 = vrot.slane %v1211_v45, %v3073_v35  ;;  %v1225_v57 = vrot.slane %v1197_v47, %v3068_v28  ;;  %v1227_v58 = vcombine.high %v1211_v45, %v1211_v45 }
 0x4cc   :  { %2490 = vmatprep.subr.mxu0 %v2734_v33  ;;  %v3259_v40 = vsel %vm1728_vm3, %v3178_v7, %v1517_v38  ;;  %v3263_v59 = vsel %vm1728_vm3, %v3182_v63, %v1521_v55  ;;  %v1525_v60 = vrot.slane %v1228_v6, %v3073_v35  ;;  %v2590_v6 = vld [vmem:[#allocation7 + $0x50] sm:$0xff] }
 0x4cd   :  { %2491 = vmatpush3.msra.mxu0 %v2844_v46  ;;  %v3269_v43 = vsel %vm1728_vm3, %v3188_v17, %v1529_v56  ;;  %v1533_v62 = vrot.slane %v1225_v57, %v3073_v35  ;;  %v1537_v0 = vrot.slane %v1227_v58, %v3073_v35  ;;  %v1229_v1 = vcombine.high %v1225_v57, %v1225_v57 }
 0x4ce   :  { %2492 = vmatprep.subr.mxu0 %v2734_v33  ;;  %v3276_v2 = vsel %vm1728_vm3, %v3195_v11, %v1525_v60  ;;  %v2592_v60 = vld [vmem:[#allocation7 + $0x40] sm:$0xff] }
 0x4cf   :  { %2493 = vmatpush3.msra.mxu0 %v2848_v48  ;;  %v3281_v46 = vsel %vm1728_vm3, %v3200_v13, %v1533_v62  ;;  %v3285_v3 = vsel %vm1728_vm3, %v3204_v23, %v1537_v0  ;;  %v1541_v5 = vrot.slane %v1229_v1, %v3073_v35  ;;  %v2594_v62 = vld [vmem:[#allocation7 + $0x30] sm:$0xff] }
 0x4d0   :  { %2494 = vmatprep.subr.mxu0 %v2734_v33 }
 0x4d1   :  { %2495 = vmatpush3.msra.mxu0 %v2852_v49  ;;  %v3292_v7 = vsel %vm1728_vm3, %v3211_v29, %v1541_v5 }
 0x4d2   :  { %2496 = vmatprep.subr.mxu0 %v2734_v33 }
 0x4d3   :  { %2497 = vmatpush3.msra.mxu0 %v2856_v50 }
 0x4d4   :  { %2498 = vmatprep.subr.mxu0 %v2734_v33 }
 0x4d5   :  { %2499 = vmatpush3.msra.mxu0 %v2860_v51 }
 0x4d6   :  { %2500 = vmatprep.subr.mxu0 %v2734_v33 }
 0x4d7   :  { %2501 = vmatpush3.msra.mxu0 %v2864_v52 }
 0x4d8   :  { %2502 = vmatprep.subr.mxu0 %v2734_v33 }
 0x4d9   :  { %2503 = vmatpush3.msra.mxu0 %v2908_v12 }
 0x4da   :  { %2504 = vmatprep.subr.mxu0 %v2734_v33 }
 0x4db   :  { %2505 = vmatpush3.msra.mxu0 %v2912_v14 }
 0x4dc   :  { %2506 = vmatprep.subr.mxu0 %v2734_v33 }
 0x4dd   :  { %2507 = vmatpush3.msra.mxu0 %v2916_v16 }
 0x4de   :  { %2508 = vmatprep.subr.mxu0 %v2734_v33 }
 0x4df   :  { %2509 = vmatpush3.msra.mxu0 %v2920_v18 }
 0x4e0   :  { %2510 = vmatprep.subr.mxu0 %v2734_v33 }
 0x4e1   :  { %2511 = vmatpush3.msra.mxu0 %v2924_v20 }
 0x4e2   :  { %2512 = vmatprep.subr.mxu0 %v2734_v33 }
 0x4e3   :  { %2513 = vmatpush3.msra.mxu0 %v2928_v21 }
 0x584   :  { %v803_v48 = vpop.f32.mrf.mxu0 }
 0x585   :  { %v804_v49 = vadd.f32 %v803_v48, %v3023_v10  ;;  %v2586_v10 = vld [vmem:[#allocation7 + $0x70] sm:$0xff] }
 0x586   :  { %v2446_v50 = vpop.f32.mrf.mxu0 }
 0x587   :  { %2577 = vtanh.f32 %v804_v49 }
 0x594   :  { %v2578_v51 = vpop.eup %2577 }
 0x595   :  { %2480 = vmatmul.mubr.f32.vlgmr.msra.gmra.mxu1 %v2578_v51  ;;  %v1238_v52 = vrot.slane %v2578_v51, %v3068_v28  ;;  %v1231_v63 = vcombine.high %v2578_v51, %v2578_v51 }
 0x596   :  { %2518 = vmatpush3.msra.mxu1 %v2585_v9  ;;  %2549 = vmatprep.mubr.msk.f32.mxu1 %vm2736_vm0, %v2734_v33 }
 0x597   :  { %2519 = vmatprep.subr.mxu1 %v2734_v33  ;;  %v1254_v17 = vrot.slane %v1238_v52, %v3068_v28  ;;  %v1246_v19 = vcombine.high %v1238_v52, %v1238_v52  ;;  %v1245_v24 = vrot.slane %v1231_v63, %v3068_v28 }
 0x598   :  { %2520 = vmatpush3.msra.mxu1 %v2586_v10 }
 0x599   :  { %2521 = vmatprep.subr.mxu1 %v2734_v33  ;;  %v1553_v25 = vrot.slane %v1254_v17, %v3073_v35  ;;  %v1268_v11 = vrot.slane %v1246_v19, %v3068_v28  ;;  %v1276_v13 = vcombine.high %v1254_v17, %v1254_v17  ;;  %v1261_v23 = vrot.slane %v1245_v24, %v3068_v28 }
 0x59a   :  { %2522 = vmatpush3.msra.mxu1 %v2587_v27  ;;  %v1247_v29 = vcombine.high %v1245_v24, %v1245_v24 }
 0x59b   :  { %2523 = vmatprep.subr.mxu1 %v2734_v33  ;;  %v3326_v30 = vsel %vm1737_vm4, %v3249_v54, %v1553_v25  ;;  %v1557_v31 = vrot.slane %v1268_v11, %v3073_v35  ;;  %v1561_v32 = vrot.slane %v1276_v13, %v3073_v35  ;;  %v1278_v34 = vcombine.high %v1268_v11, %v1268_v11 }
 0x59c   :  { %2524 = vmatpush3.msra.mxu1 %v2588_v37  ;;  %v1569_v53 = vrot.slane %v1261_v23, %v3073_v35  ;;  %v1275_v39 = vrot.slane %v1247_v29, %v3068_v28  ;;  %v1277_v41 = vcombine.high %v1261_v23, %v1261_v23  ;;  %v1802_v37 = vld [vmem:[#allocation8 + $0xe8] sm:$0xff] }
 0x59d   :  { %2525 = vmatprep.subr.mxu1 %v2734_v33  ;;  %v3335_v42 = vsel %vm1737_vm4, %v3259_v40, %v1557_v31  ;;  %v3339_v4 = vsel %vm1737_vm4, %v3263_v59, %v1561_v32  ;;  %v1565_v44 = vrot.slane %v1278_v34, %v3073_v35  ;;  %v2591_v40 = vld [vmem:[#allocation7 + $0x48] sm:$0xff]  ;;  %v1804_v32 = vld [vmem:[#allocation8 + $0xf8] sm:$0xff]  ;;  %v1803_v34 = vld [vmem:[#allocation8 + $0xf0] sm:$0xff] }
 0x59e   :  { %2526 = vmatpush3.msra.mxu1 %v2589_v36  ;;  %v3344_v45 = vsel %vm1737_vm4, %v3269_v43, %v1569_v53  ;;  %v1573_v47 = vrot.slane %v1275_v39, %v3073_v35  ;;  %v1577_v54 = vrot.slane %v1277_v41, %v3073_v35  ;;  %v1279_v38 = vcombine.high %v1275_v39, %v1275_v39  ;;  %v2593_v43 = vld [vmem:[#allocation7 + $0x38] sm:$0xff]  ;;  %v1801_v53 = vld [vmem:[#allocation8 + $0xe0] sm:$0xff]  ;;  %v1799_v41 = vld [vmem:[#allocation8 + $0xd0] sm:$0xff] }
 0x59f   :  { %2527 = vmatprep.subr.mxu1 %v2734_v33  ;;  %v3351_v55 = vsel %vm1737_vm4, %v3276_v2, %v1565_v44  ;;  %1817 = vmatprep.subr.mxu0 %v1804_v32  ;;  %v1800_v39 = vld [vmem:[#allocation8 + $0xd8] sm:$0xff]  ;;  %v428_v44 = vadd.f32 %v3009_v61, %v3062_v22  ;;  %v1779_v32 = vld [vmem:[#allocation8 + $0x30] sm:$0xff] }
 0x5a0   :  { %2528 = vmatpush3.msra.mxu1 %v2590_v6  ;;  %v1743_v56 = vsel %vm1737_vm4, %v3281_v46, %v1573_v47  ;;  %v1744_v57 = vsel %vm1737_vm4, %v3285_v3, %v1577_v54  ;;  %v1581_v58 = vrot.slane %v1279_v38, %v3073_v35 }
 0x5a1   :  { %2529 = vmatprep.subr.mxu1 %v2734_v33 }
 0x5a2   :  { %2530 = vmatpush3.msra.mxu1 %v2591_v40  ;;  %v1745_v59 = vsel %vm1737_vm4, %v3292_v7, %v1581_v58 }
 0x5a3   :  { %2531 = vmatprep.subr.mxu1 %v2734_v33 }
 0x5a4   :  { %2532 = vmatpush3.msra.mxu1 %v2592_v60 }
 0x5a5   :  { %2533 = vmatprep.subr.mxu1 %v2734_v33 }
 0x5a6   :  { %2534 = vmatpush3.msra.mxu1 %v2593_v43 }
 0x5a7   :  { %2535 = vmatprep.subr.mxu1 %v2734_v33 }
 0x5a8   :  { %2536 = vmatpush3.msra.mxu1 %v2594_v62 }
 0x5a9   :  { %2537 = vmatprep.subr.mxu1 %v2734_v33 }
 0x5aa   :  { %2538 = vmatpush3.msra.mxu1 %v2908_v12 }
 0x5ab   :  { %2539 = vmatprep.subr.mxu1 %v2734_v33 }
 0x5ac   :  { %2540 = vmatpush3.msra.mxu1 %v2912_v14 }
 0x5ad   :  { %2541 = vmatprep.subr.mxu1 %v2734_v33 }
 0x5ae   :  { %2542 = vmatpush3.msra.mxu1 %v2916_v16 }
 0x5af   :  { %2543 = vmatprep.subr.mxu1 %v2734_v33 }
 0x5b0   :  { %2544 = vmatpush3.msra.mxu1 %v2920_v18 }
 0x5b1   :  { %2545 = vmatprep.subr.mxu1 %v2734_v33 }
 0x5b2   :  { %2546 = vmatpush3.msra.mxu1 %v2924_v20 }
 0x5b3   :  { %2547 = vmatprep.subr.mxu1 %v2734_v33 }
 0x5b4   :  { %2548 = vmatpush3.msra.mxu1 %v2928_v21 }
 0x655   :  { %v874_v12 = vpop.f32.mrf.mxu1 }
 0x656   :  { %v875_v0 = vadd.f32 %v874_v12, %v3020_v8 }
 0x657   :  { %v2481_v14 = vpop.f32.mrf.mxu1 }
 0x658   :  { %2579 = vtanh.f32 %v875_v0 }
 0x665   :  { %v2580_v1 = vpop.eup %2579 }
 0x666   :  { %2515 = vmatmul.mubr.f32.vlgmr.msra.gmra.mxu0 %v2580_v1  ;;  %v1288_v16 = vrot.slane %v2580_v1, %v3068_v28  ;;  %v1281_v2 = vcombine.high %v2580_v1, %v2580_v1 }
 0x667   :  { %1881 = vmatprep.mubr.f32.mxu0 %v2734_v33  ;;  %1818 = vmatpush1.msra.mxu0 %v1803_v34  ;;  %v1778_v34 = vld [vmem:[#allocation8 + $0x28] sm:$0xff] }
 0x668   :  { %v1304_v18 = vrot.slane %v1288_v16, %v3068_v28  ;;  %v1296_v46 = vcombine.high %v1288_v16, %v1288_v16  ;;  %v1295_v20 = vrot.slane %v1281_v2, %v3068_v28  ;;  %1819 = vmatprep.subr.mxu0 %v1802_v37  ;;  %v1777_v37 = vld [vmem:[#allocation8 + $0x20] sm:$0xff] }
 0x669   :  { %1820 = vmatpush1.msra.mxu0 %v1801_v53  ;;  %v1776_v53 = vld [vmem:[#allocation8 + $0x18] sm:$0xff] }
 0x66a   :  { %v1593_v21 = vrot.slane %v1304_v18, %v3073_v35  ;;  %v1318_v3 = vrot.slane %v1296_v46, %v3068_v28  ;;  %v1326_v8 = vcombine.high %v1304_v18, %v1304_v18  ;;  %v1311_v5 = vrot.slane %v1295_v20, %v3068_v28  ;;  %1821 = vmatprep.subr.mxu0 %v1800_v39  ;;  %v1775_v39 = vld [vmem:[#allocation8 + $0x10] sm:$0xff] }
 0x66b   :  { %v1297_v7 = vcombine.high %v1295_v20, %v1295_v20  ;;  %1822 = vmatpush1.msra.mxu0 %v1799_v41  ;;  %v1774_v41 = vld [vmem:[#allocation8 + $0x8] sm:$0xff] }
 0x66c   :  { %v1747_v48 = vsel %vm1746_vm5, %v3326_v30, %v1593_v21  ;;  %v1597_v49 = vrot.slane %v1318_v3, %v3073_v35  ;;  %v1601_v50 = vrot.slane %v1326_v8, %v3073_v35  ;;  %v1328_v51 = vcombine.high %v1318_v3, %v1318_v3 }
 0x66d   :  { %v1609_v52 = vrot.slane %v1311_v5, %v3073_v35  ;;  %v1325_v63 = vrot.slane %v1297_v7, %v3068_v28  ;;  %v1327_v9 = vcombine.high %v1311_v5, %v1311_v5 }
 0x66e   :  { %v1748_v17 = vsel %vm1746_vm5, %v3335_v42, %v1597_v49  ;;  %v1749_v19 = vsel %vm1746_vm5, %v3339_v4, %v1601_v50  ;;  %v1605_v24 = vrot.slane %v1328_v51, %v3073_v35  ;;  %v1798_v42 = vld [vmem:[#allocation8 + $0xc8] sm:$0xff]  ;;  %v1797_v4 = vld [vmem:[#allocation8 + $0xc0] sm:$0xff]  ;;  %v1796_v50 = vld [vmem:[#allocation8 + $0xb8] sm:$0xff] }
 0x66f   :  { %v1751_v10 = vsel %vm1746_vm5, %v3344_v45, %v1609_v52  ;;  %v1613_v25 = vrot.slane %v1325_v63, %v3073_v35  ;;  %v1617_v11 = vrot.slane %v1327_v9, %v3073_v35  ;;  %v1329_v13 = vcombine.high %v1325_v63, %v1325_v63  ;;  %1823 = vmatprep.subr.mxu0 %v1798_v42  ;;  %v1795_v51 = vld [vmem:[#allocation8 + $0xb0] sm:$0xff]  ;;  %v1794_v52 = vld [vmem:[#allocation8 + $0xa8] sm:$0xff]  ;;  %v1793_v63 = vld [vmem:[#allocation8 + $0xa0] sm:$0xff] }
 0x670   :  { %v1750_v23 = vsel %vm1746_vm5, %v3351_v55, %v1605_v24  ;;  %1824 = vmatpush1.msra.mxu0 %v1797_v4  ;;  %v1792_v9 = vld [vmem:[#allocation8 + $0x98] sm:$0xff]  ;;  %v1789_v24 = vld [vmem:[#allocation8 + $0x80] sm:$0xff] }
 0x671   :  { %v1752_v27 = vsel %vm1746_vm5, %v1743_v56, %v1613_v25  ;;  %v1753_v29 = vsel %vm1746_vm5, %v1744_v57, %v1617_v11  ;;  %v1621_v30 = vrot.slane %v1329_v13, %v3073_v35  ;;  %1825 = vmatprep.subr.mxu0 %v1796_v50  ;;  %v1787_v25 = vld [vmem:[#allocation8 + $0x70] sm:$0xff]  ;;  %v1786_v11 = vld [vmem:[#allocation8 + $0x68] sm:$0xff]  ;;  %v1785_v13 = vld [vmem:[#allocation8 + $0x60] sm:$0xff] }
 0x672   :  { %1826 = vmatpush1.msra.mxu0 %v1795_v51  ;;  %v1773_v42 = vld [vmem:[#allocation8] sm:$0xff] }
 0x673   :  { %v1754_v31 = vsel %vm1746_vm5, %v1745_v59, %v1621_v30  ;;  %1827 = vmatprep.subr.mxu0 %v1794_v52  ;;  %v1781_v30 = vld [vmem:[#allocation8 + $0x40] sm:$0xff] }
 0x674   :  { %1828 = vmatpush1.msra.mxu0 %v1793_v63 }
 0x675   :  { %1829 = vmatprep.subr.mxu0 %v1792_v9 }
 0x726   :  { %v945_v36 = vpop.f32.mrf.mxu0 }
 0x727   :  { %v946_v45 = vadd.f32 %v945_v36, %v428_v44 }
 0x728   :  { %v2516_v47 = vpop.f32.mrf.mxu0 }
 0x729   :  { %2581 = vtanh.f32 %v946_v45 }
 0x736   :  { %v2582_v54 = vpop.eup %2581 }
 0x737   :  { %2550 = vmatmul.mubr.f32.vlgmr.msra.gmra.mxu1 %v2582_v54  ;;  %v1338_v38 = vrot.slane %v2582_v54, %v3068_v28  ;;  %v1331_v55 = vcombine.high %v2582_v54, %v2582_v54 }
 0x739   :  { %v1354_v6 = vrot.slane %v1338_v38, %v3068_v28  ;;  %v1346_v56 = vcombine.high %v1338_v38, %v1338_v38  ;;  %v1345_v57 = vrot.slane %v1331_v55, %v3068_v28 }
 0x73b   :  { %v1633_v58 = vrot.slane %v1354_v6, %v3073_v35  ;;  %v1368_v40 = vrot.slane %v1346_v56, %v3068_v28  ;;  %v1376_v61 = vcombine.high %v1354_v6, %v1354_v6  ;;  %v1361_v22 = vrot.slane %v1345_v57, %v3068_v28 }
 0x73c   :  { %v1347_v59 = vcombine.high %v1345_v57, %v1345_v57 }
 0x73d   :  { %v3414_v60 = vsel %vm1755_vm6, %v1747_v48, %v1633_v58  ;;  %v1637_v43 = vrot.slane %v1368_v40, %v3073_v35  ;;  %v1641_v62 = vrot.slane %v1376_v61, %v3073_v35  ;;  %v1378_v12 = vcombine.high %v1368_v40, %v1368_v40 }
 0x73e   :  { %v1649_v0 = vrot.slane %v1361_v22, %v3073_v35  ;;  %v1375_v14 = vrot.slane %v1347_v59, %v3068_v28  ;;  %v1377_v1 = vcombine.high %v1361_v22, %v1361_v22 }
 0x73f   :  { %v3421_v16 = vsel %vm1755_vm6, %v1748_v17, %v1637_v43  ;;  %v3424_v2 = vsel %vm1755_vm6, %v1749_v19, %v1641_v62  ;;  %v1645_v18 = vrot.slane %v1378_v12, %v3073_v35  ;;  %v1791_v17 = vld [vmem:[#allocation8 + $0x90] sm:$0xff]  ;;  %v1790_v19 = vld [vmem:[#allocation8 + $0x88] sm:$0xff] }
 0x740   :  { %v3428_v46 = vsel %vm1755_vm6, %v1751_v10, %v1649_v0  ;;  %v1653_v20 = vrot.slane %v1375_v14, %v3073_v35  ;;  %v1657_v21 = vrot.slane %v1377_v1, %v3073_v35  ;;  %v1379_v3 = vcombine.high %v1375_v14, %v1375_v14  ;;  %1830 = vmatpush1.msra.mxu0 %v1791_v17  ;;  %v1788_v10 = vld [vmem:[#allocation8 + $0x78] sm:$0xff] }
 0x741   :  { %v3433_v8 = vsel %vm1755_vm6, %v1750_v23, %v1645_v18  ;;  %1831 = vmatprep.subr.mxu0 %v1790_v19  ;;  %v1784_v23 = vld [vmem:[#allocation8 + $0x58] sm:$0xff] }
 0x742   :  { %v3436_v5 = vsel %vm1755_vm6, %v1752_v27, %v1653_v20  ;;  %v3439_v7 = vsel %vm1755_vm6, %v1753_v29, %v1657_v21  ;;  %v1661_v48 = vrot.slane %v1379_v3, %v3073_v35  ;;  %1832 = vmatpush1.msra.mxu0 %v1789_v24  ;;  %v1783_v27 = vld [vmem:[#allocation8 + $0x50] sm:$0xff]  ;;  %v1782_v29 = vld [vmem:[#allocation8 + $0x48] sm:$0xff] }
 0x743   :  { %1833 = vmatprep.subr.mxu0 %v1788_v10 }
 0x744   :  { %v3443_v49 = vsel %vm1755_vm6, %v1754_v31, %v1661_v48  ;;  %1834 = vmatpush1.msra.mxu0 %v1787_v25  ;;  %v1780_v31 = vld [vmem:[#allocation8 + $0x38] sm:$0xff] }
 0x745   :  { %1835 = vmatprep.subr.mxu0 %v1786_v11 }
 0x746   :  { %1836 = vmatpush1.msra.mxu0 %v1785_v13 }
 0x747   :  { %1837 = vmatprep.subr.mxu0 %v1784_v23 }
 0x748   :  { %1838 = vmatpush1.msra.mxu0 %v1783_v27 }
 0x749   :  { %1839 = vmatprep.subr.mxu0 %v1782_v29 }
 0x74a   :  { %1840 = vmatpush1.msra.mxu0 %v1781_v30 }
 0x74b   :  { %1841 = vmatprep.subr.mxu0 %v1780_v31 }
 0x74c   :  { %1842 = vmatpush1.msra.mxu0 %v1779_v32 }
 0x74d   :  { %1843 = vmatprep.subr.mxu0 %v1778_v34 }
 0x74e   :  { %1844 = vmatpush1.msra.mxu0 %v1777_v37 }
 0x74f   :  { %1845 = vmatprep.subr.mxu0 %v1776_v53 }
 0x750   :  { %1846 = vmatpush1.msra.mxu0 %v1775_v39 }
 0x751   :  { %1847 = vmatprep.subr.mxu0 %v1774_v41 }
 0x752   :  { %1848 = vmatpush1.msra.mxu0 %v1773_v42 }
 0x7f7   :  { %v1016_v4 = vpop.f32.mrf.mxu1 }
 0x7f8   :  { %v1017_v44 = vadd.f32 %v1016_v4, %v3031_v15 }
 0x7f9   :  { %v2551_v36 = vpop.f32.mrf.mxu1 }
 0x7fa   :  { %2583 = vtanh.f32 %v1017_v44 }
 0x807   :  { %v2584_v45 = vpop.eup %2583 }
 0x808   :  { %1021 = vst [vmem:[#allocation11] sm:$0xff] %v2584_v45  ;;  %v1388_v47 = vrot.slane %v2584_v45, %v3068_v28  ;;  %v1381_v54 = vcombine.high %v2584_v45, %v2584_v45 }
 0x80a   :  { %v1404_v38 = vrot.slane %v1388_v47, %v3068_v28  ;;  %v1396_v55 = vcombine.high %v1388_v47, %v1388_v47  ;;  %v1395_v6 = vrot.slane %v1381_v54, %v3068_v28 }
 0x80c   :  { %v1673_v56 = vrot.slane %v1404_v38, %v3073_v35  ;;  %v1418_v57 = vrot.slane %v1396_v55, %v3068_v28  ;;  %v1426_v58 = vcombine.high %v1404_v38, %v1404_v38  ;;  %v1411_v15 = vrot.slane %v1395_v6, %v3068_v28 }
 0x80d   :  { %v1397_v40 = vcombine.high %v1395_v6, %v1395_v6 }
 0x80e   :  { %v1765_v61 = vsel %vm1764_vm7, %v3414_v60, %v1673_v56  ;;  %v1677_v22 = vrot.slane %v1418_v57, %v3073_v35  ;;  %v1681_v59 = vrot.slane %v1426_v58, %v3073_v35  ;;  %v1428_v43 = vcombine.high %v1418_v57, %v1418_v57 }
 0x80f   :  { %1882 = vmatmul.mubr.f32.vlgmr.msra.gmra.mxu0 %v1765_v61  ;;  %v1689_v62 = vrot.slane %v1411_v15, %v3073_v35  ;;  %v1425_v12 = vrot.slane %v1397_v40, %v3068_v28  ;;  %v1427_v0 = vcombine.high %v1411_v15, %v1411_v15 }
 0x810   :  { %1887 = vmatprep.mubr.f32.mxu0 %v2734_v33  ;;  %v1766_v14 = vsel %vm1764_vm7, %v3421_v16, %v1677_v22  ;;  %v1767_v1 = vsel %vm1764_vm7, %v3424_v2, %v1681_v59  ;;  %v1685_v60 = vrot.slane %v1428_v43, %v3073_v35 }
 0x811   :  { %v1769_v18 = vsel %vm1764_vm7, %v3428_v46, %v1689_v62  ;;  %v1693_v20 = vrot.slane %v1425_v12, %v3073_v35  ;;  %v1697_v21 = vrot.slane %v1427_v0, %v3073_v35  ;;  %v1429_v3 = vcombine.high %v1425_v12, %v1425_v12 }
 0x812   :  { %v1768_v28 = vsel %vm1764_vm7, %v3433_v8, %v1685_v60 }
 0x813   :  { %1888 = vmatmul.mubr.f32.gmra.mxu0 %v1766_v14  ;;  %v1770_v16 = vsel %vm1764_vm7, %v3436_v5, %v1693_v20  ;;  %v1771_v2 = vsel %vm1764_vm7, %v3439_v7, %v1697_v21  ;;  %v1701_v48 = vrot.slane %v1429_v3, %v3073_v35 }
 0x814   :  { %1893 = vmatprep.mubr.f32.mxu0 %v2734_v33 }
 0x815   :  { %v1772_v46 = vsel %vm1764_vm7, %v3443_v49, %v1701_v48 }
 0x817   :  { %1894 = vmatmul.mubr.f32.gmra.mxu0 %v1767_v1 }
 0x818   :  { %1899 = vmatprep.mubr.f32.mxu0 %v2734_v33 }
 0x81b   :  { %1900 = vmatmul.mubr.f32.gmra.mxu0 %v1768_v28 }
 0x81c   :  { %1905 = vmatprep.mubr.f32.mxu0 %v2734_v33 }
 0x81f   :  { %1906 = vmatmul.mubr.f32.gmra.mxu0 %v1769_v18 }
 0x820   :  { %1911 = vmatprep.mubr.f32.mxu0 %v2734_v33 }
 0x823   :  { %1912 = vmatmul.mubr.f32.gmra.mxu0 %v1770_v16 }
 0x824   :  { %1917 = vmatprep.mubr.f32.mxu0 %v2734_v33 }
 0x827   :  { %1918 = vmatmul.mubr.f32.gmra.mxu0 %v1771_v2 }
 0x828   :  { %1923 = vmatprep.mubr.f32.mxu0 %v2734_v33 }
 0x82b   :  { %1924 = vmatmul.mubr.f32.gmra.mxu0 %v1772_v46 }
 0x82c   :  { %2686 = shalt.err (!%p2683_p10)
}
 0x82d   :  { %1967 = dma.vmem_to_hbm [thread:$0]  %s1965_s3, 128, %s3506_s9, [#allocation12]   ;;  %v1805_v8 = vld [vmem:[%s3504_s7] sm:$0x3]  ;;  %v1813_v33 = vsub.s32 1, %v3065_v26 }
 0x82e   :  { %v1810_v5 = vrot.slane %v1805_v8, %v3073_v35  ;;  %s2739_s7 = smov [#allocation10]  }
 0x82f   :  { %v1814_v7 = vrot.slane %v1805_v8, %v1813_v33  ;;  %s1951_s9 = sshll.u32 %s2739_s7, 4  ;;  %s1952_s9 = int_to_ptr.vmem [resolvable:$true] %s1951_s9 }
 0x830   :  { %s2695_s10 = scalar_lea.vmem %s1952_s9, 2048  ;;  %p2700_p12 = scmp.lt.s32.totalorder %s1952_s9, %s1952_s9 }
 0x831   :  { %p2696_p11 = scmp.ne.s32.totalorder %s1952_s9, %s2695_s10  ;;  %p2701_p13 = scmp.lt.s32.totalorder %s2695_s10, %s2695_s10 }
 0x833   :  { %p2702_p0 = por %p2701_p13, %p2700_p12 }
 0x835   :  { %p2703_p1 = pnand %p2702_p0, %p2696_p11 }
 0x8cf   :  { %v1883_v49 = vpop.f32.mrf.mxu0 }
 0x8d0   :  { %v1884_v50 = vadd.f32 %v1883_v49, %v1810_v5 }
 0x8d1   :  { %v1885_v51 = vpop.f32.mrf.mxu0 }
 0x8d2   :  { %1930 = vst [vmem:[#allocation10] sm:$0xff] %v1884_v50  ;;  %v1886_v52 = vadd.f32 %v1885_v51, %v1814_v7 }
 0x8d3   :  { %v1889_v63 = vpop.f32.mrf.mxu0 }
 0x8d4   :  { %1931 = vst [vmem:[#allocation10 + $0x8] sm:$0xff] %v1886_v52  ;;  %v1890_v9 = vadd.f32 %v1889_v63, %v1810_v5 }
 0x8d5   :  { %v1891_v17 = vpop.f32.mrf.mxu0 }
 0x8d6   :  { %1932 = vst [vmem:[#allocation10 + $0x10] sm:$0xff] %v1890_v9  ;;  %v1892_v19 = vadd.f32 %v1891_v17, %v1814_v7 }
 0x8d7   :  { %v1895_v24 = vpop.f32.mrf.mxu0 }
 0x8d8   :  { %1933 = vst [vmem:[#allocation10 + $0x18] sm:$0xff] %v1892_v19  ;;  %v1896_v10 = vadd.f32 %v1895_v24, %v1810_v5 }
 0x8d9   :  { %v1897_v25 = vpop.f32.mrf.mxu0 }
 0x8da   :  { %1934 = vst [vmem:[#allocation10 + $0x20] sm:$0xff] %v1896_v10  ;;  %v1898_v26 = vadd.f32 %v1897_v25, %v1814_v7 }
 0x8db   :  { %v1901_v11 = vpop.f32.mrf.mxu0 }
 0x8dc   :  { %1935 = vst [vmem:[#allocation10 + $0x28] sm:$0xff] %v1898_v26  ;;  %v1902_v35 = vadd.f32 %v1901_v11, %v1810_v5 }
 0x8dd   :  { %v1903_v13 = vpop.f32.mrf.mxu0 }
 0x8de   :  { %1936 = vst [vmem:[#allocation10 + $0x30] sm:$0xff] %v1902_v35  ;;  %v1904_v23 = vadd.f32 %v1903_v13, %v1814_v7 }
 0x8df   :  { %v1907_v27 = vpop.f32.mrf.mxu0 }
 0x8e0   :  { %1937 = vst [vmem:[#allocation10 + $0x38] sm:$0xff] %v1904_v23  ;;  %v1908_v29 = vadd.f32 %v1907_v27, %v1810_v5 }
 0x8e1   :  { %v1909_v30 = vpop.f32.mrf.mxu0 }
 0x8e2   :  { %1938 = vst [vmem:[#allocation10 + $0x40] sm:$0xff] %v1908_v29  ;;  %v1910_v31 = vadd.f32 %v1909_v30, %v1814_v7 }
 0x8e3   :  { %v1913_v32 = vpop.f32.mrf.mxu0 }
 0x8e4   :  { %1939 = vst [vmem:[#allocation10 + $0x48] sm:$0xff] %v1910_v31  ;;  %v1914_v34 = vadd.f32 %v1913_v32, %v1810_v5 }
 0x8e5   :  { %v1915_v37 = vpop.f32.mrf.mxu0 }
 0x8e6   :  { %1940 = vst [vmem:[#allocation10 + $0x50] sm:$0xff] %v1914_v34  ;;  %v1916_v53 = vadd.f32 %v1915_v37, %v1814_v7 }
 0x8e7   :  { %v1919_v39 = vpop.f32.mrf.mxu0 }
 0x8e8   :  { %1941 = vst [vmem:[#allocation10 + $0x58] sm:$0xff] %v1916_v53  ;;  %v1920_v41 = vadd.f32 %v1919_v39, %v1810_v5 }
 0x8e9   :  { %v1921_v42 = vpop.f32.mrf.mxu0 }
 0x8ea   :  { %1942 = vst [vmem:[#allocation10 + $0x60] sm:$0xff] %v1920_v41  ;;  %v1922_v4 = vadd.f32 %v1921_v42, %v1814_v7 }
 0x8eb   :  { %v1925_v44 = vpop.f32.mrf.mxu0 }
 0x8ec   :  { %1943 = vst [vmem:[#allocation10 + $0x68] sm:$0xff] %v1922_v4  ;;  %v1926_v36 = vadd.f32 %v1925_v44, %v1810_v5 }
 0x8ed   :  { %v1927_v45 = vpop.f32.mrf.mxu0 }
 0x8ee   :  { %1944 = vst [vmem:[#allocation10 + $0x70] sm:$0xff] %v1926_v36  ;;  %v1928_v47 = vadd.f32 %v1927_v45, %v1814_v7 }
 0x8f0   :  { %1945 = vst [vmem:[#allocation10 + $0x78] sm:$0xff] %v1928_v47 }
 0x8f1   :  { %2706 = shalt.err (!%p2703_p1)
}
 0x8f2   :  { %1957 = dma.vmem_to_hbm [thread:$0]  %s1952_s9, 2048, %s3505_s8, [#allocation4], %s2731_s1, %s2731_s1, %s2732_s28  }
 0x8f3   :  { %2721 = dma.done.wait [#allocation4], 2048  }
 0x8f4   :  { %2722 = vsyncadd [#allocation4], 4294965248 }
 0x8f5   :  { %2723 = dma.done.wait [#allocation12], 128  }
 0x8f6   :  { %2724 = vsyncadd [#allocation12], 4294967168 }
 0x8f7   :  { %1974 = vsyncpa [#allocation3], 1 }
 0x8f8   :  { %1975 = vsyncpa [#allocation6], 1 }
 0x8f9   :  { %1976 = vsyncpa [#allocation9], 1 }
 0x8fa   :  { %1977 = vsyncpa [#allocation4], 1 }
 0x8fb   :  { %1978 = vsyncpa [#allocation12], 1 }

</bundles_post_ra>
